<compile_context>
chip_gen: v5e
topology: v5e:2x2
jax: 0.10.0
libtpu: 0.0.40
codegen_flags: <defaults>
</compile_context>

<pallas_src>
import math
import functools

import jax
import jax.numpy as jnp
from jax.experimental import pallas as pl
from jax.experimental.pallas import tpu as pltpu


# ----------------------------- helpers ------------------------------------ #

def _layernorm(x, gamma, beta, eps):
    mu = jnp.mean(x, axis=-1, keepdims=True)
    var = jnp.mean((x - mu) ** 2, axis=-1, keepdims=True)
    return (x - mu) * jax.lax.rsqrt(var + eps) * gamma + beta


def _gelu_exact(x):
    # exact (erf-based) GELU, matching HF ACT2FN["gelu"] used by BERT
    # TODO(synk): tanh-approx GELU would move this to the EUP slot, but changes
    #             numerics vs. HF "gelu"; keep exact unless accuracy-checked.
    return 0.5 * x * (1.0 + jax.lax.erf(x * (1.0 / math.sqrt(2.0))))


# ----------------------------- kernel ------------------------------------- #

def bert_layer_kernel(xq_ref, xs_ref,
                      wq_ref, bq_ref, wkv_ref, bkv_ref,
                      wo_ref, bo_ref, ln1g_ref, ln1b_ref,
                      w1_ref, b1_ref, w2_ref, b2_ref,
                      ln2g_ref, ln2b_ref,
                      out_ref, *, num_heads, eps):
    xq = xq_ref[0]                                   # (TQ, H) fp32 (residual path)
    TQ, H = xq.shape
    hd = H // num_heads

    xqb = xq.astype(jnp.bfloat16)
    xsb = xs_ref[0].astype(jnp.bfloat16)             # (S, H) bf16, full sequence
    S = xsb.shape[0]

    # ---- projections; 1/sqrt(hd) already folded into wq/bq host-side -------
    q = jnp.dot(xqb, wq_ref[...], preferred_element_type=jnp.float32) + bq_ref[...]
    kv = jnp.dot(xsb, wkv_ref[...], preferred_element_type=jnp.float32) + bkv_ref[...]

    # ---- head split: one bf16 cast + one relayout per tensor ----------------
    qh = q.astype(jnp.bfloat16).reshape(TQ, num_heads, hd).transpose(1, 0, 2)
    kvb = kv.astype(jnp.bfloat16)                    # (S, 2H) bf16, cast once
    kh = kvb[:, :H].reshape(S, num_heads, hd).transpose(1, 0, 2)
    vh = kvb[:, H:].reshape(S, num_heads, hd).transpose(1, 0, 2)

    # ---- attention: (nh, TQ, S) scores, fp32 softmax, EUP reciprocal --------
    s = jnp.einsum('hqd,hkd->hqk', qh, kh, preferred_element_type=jnp.float32)
    s = s - jnp.max(s, axis=-1, keepdims=True)
    p = jnp.exp(s)
    p = p * pl.reciprocal(jnp.sum(p, axis=-1, keepdims=True), approx=True)
    ctx = jnp.einsum('hqk,hkd->hqd', p.astype(jnp.bfloat16), vh,
                     preferred_element_type=jnp.float32)       # (nh, TQ, hd)

    # ---- merge heads once; full-depth (K=H) output projection ---------------
    ctx_m = ctx.transpose(1, 0, 2).reshape(TQ, H).astype(jnp.bfloat16)
    attn = jnp.dot(ctx_m, wo_ref[...],
                   preferred_element_type=jnp.float32) + bo_ref[...]

    # ---- BertSelfOutput: post-LN residual 1 ---------------------------------
    h1 = _layernorm(attn + xq, ln1g_ref[...], ln1b_ref[...], eps)

    # ---- (Sub)BertIntermediate + (Sub)BertOutput ----------------------------
    inter = _gelu_exact(
        jnp.dot(h1.astype(jnp.bfloat16), w1_ref[...],
                preferred_element_type=jnp.float32) + b1_ref[...])
    mlp = jnp.dot(inter.astype(jnp.bfloat16), w2_ref[...],
                  preferred_element_type=jnp.float32) + b2_ref[...]

    # ---- post-LN residual 2 (dropout = identity in eval) --------------------
    out_ref[0] = _layernorm(mlp + h1, ln2g_ref[...], ln2b_ref[...], eps)


# ----------------------------- wrapper ------------------------------------ #

_PARAM_ORDER = ["wq", "bq", "wkv", "bkv", "wo", "bo", "ln1_g", "ln1_b",
                "w1", "b1", "w2", "b2", "ln2_g", "ln2_b"]


def _pick_query_tile(S):
    """Largest query tile that divides S and keeps VMEM O(TQ*S)."""
    if S >= 512 and S % 256 == 0:
        return 256          # multiple of 256: fills v6e/v7x's 256-wide MXU
    if S > 128 and S % 128 == 0:
        return 128
    return S                 # small sequences: one tile (full-dim block)


def _vmem_limit_bytes(weight_bytes, tile_bytes):
    """Request weights + pipelined tiles + temporaries + headroom, capped to HW."""
    try:
        cap = pltpu.get_tpu_info().vmem_capacity_bytes
    except Exception:
        cap = 64 * 1024 * 1024                       # conservative (v7x per-TC)
    want = weight_bytes + tile_bytes + (4 << 20)     # 4 MiB headroom
    want = max(want, 24 << 20)                       # keep pipeline headroom
    return int(min(want, cap * 3 // 4))


def bert_layer(x, params, *, num_heads, eps=1e-12):
    """One (Sub)BertLayer forward. x: [B, S, H] float32, packed bf16 weights."""
    B, S, H = x.shape
    hd = H // num_heads
    inter_dim = params["w1"].shape[1]
    plist = [params[name] for name in _PARAM_ORDER]

    TQ = _pick_query_tile(S)
    nq = S // TQ

    in_specs = [
        pl.BlockSpec((1, TQ, H), lambda b, q: (b, q, 0)),   # query tile of x
        pl.BlockSpec((1, S, H), lambda b, q: (b, 0, 0)),    # full-S x (keys/values)
    ]
    for arr in plist:
        nd = arr.ndim
        # bind ndim explicitly (avoid late-binding closure bug)
        in_specs.append(pl.BlockSpec(arr.shape, lambda b, q, _nd=nd: (0,) * _nd))

    weight_bytes = sum(int(a.size) * a.dtype.itemsize for a in plist)
    # pipelined tile buffers (double-buffered) + in-kernel temporaries
    tile_bytes = (2 * (TQ * H + S * H + TQ * H) * 4          # xq / xs / out buffers
                  + S * 2 * H * 4 + S * 2 * H * 2            # kv fp32 + bf16
                  + num_heads * TQ * S * 4 * 2               # s + p fp32
                  + num_heads * TQ * S * 2                   # p bf16
                  + num_heads * TQ * hd * 4                  # ctx
                  + TQ * inter_dim * (4 + 2)                 # inter fp32 + bf16
                  + TQ * H * 4 * 4)                          # misc fp32 temporaries

    flops = 2 * B * (S * H * H                               # Q projection
                     + nq * S * 2 * H * H                    # K/V (recomputed per q tile)
                     + 2 * S * S * H                         # scores + PV
                     + S * H * H                             # output projection
                     + 2 * S * H * inter_dim)                # FFN
    transcendentals = B * (num_heads * S * S + S * inter_dim)
    bytes_accessed = (B * S * H * 4                          # x (query tiles)
                      + B * nq * S * H * 4                   # full-S x per tile
                      + B * S * H * 4                        # output
                      + weight_bytes)

    kernel = functools.partial(bert_layer_kernel, num_heads=num_heads, eps=eps)

    return pl.pallas_call(
        kernel,
        out_shape=jax.ShapeDtypeStruct((B, S, H), jnp.float32),
        grid_spec=pltpu.PrefetchScalarGridSpec(
            num_scalar_prefetch=0,
            grid=(B, nq),            # batch x query-tile; both parallel (megacore)
            in_specs=in_specs,
            out_specs=pl.BlockSpec((1, TQ, H), lambda b, q: (b, q, 0)),
        ),
        compiler_params=pltpu.CompilerParams(
            dimension_semantics=("parallel", "parallel"),
            vmem_limit_bytes=_vmem_limit_bytes(weight_bytes, tile_bytes),
        ),
        cost_estimate=pl.CostEstimate(
            flops=flops,
            transcendentals=transcendentals,
            bytes_accessed=bytes_accessed),
    )(x, x, *plist)


def sub_bert_encoder(x, packed_layer_params, *, num_heads, eps=1e-12):
    """SubBertEncoder.forward (return_dict semantics: last_hidden_state only)."""
    # TODO(synk): attention_mask / head_mask / cross-attention / past_key_values /
    #             output_attentions / use_cache paths not implemented (None / eval path).
    hidden_states = x
    for params in packed_layer_params:
        hidden_states = bert_layer(hidden_states, params,
                                   num_heads=num_heads, eps=eps)
    return hidden_states


# ----------------------------- params ------------------------------------- #

def init_layer_params(key, hidden_size, intermediate_dim):
    """Random params in natural (in, out) layout, fp32 (also used by the reference)."""
    ks = jax.random.split(key, 16)
    std = 0.02
    H, I = hidden_size, intermediate_dim
    p = {}
    p["wq"] = std * jax.random.normal(ks[0], (H, H), jnp.float32)
    p["bq"] = 0.01 * jax.random.normal(ks[1], (1, H), jnp.float32)
    p["wk"] = std * jax.random.normal(ks[2], (H, H), jnp.float32)
    p["bk"] = 0.01 * jax.random.normal(ks[3], (1, H), jnp.float32)
    p["wv"] = std * jax.random.normal(ks[4], (H, H), jnp.float32)
    p["bv"] = 0.01 * jax.random.normal(ks[5], (1, H), jnp.float32)
    p["wo"] = std * jax.random.normal(ks[6], (H, H), jnp.float32)
    p["bo"] = 0.01 * jax.random.normal(ks[7], (1, H), jnp.float32)
    p["ln1_g"] = 1.0 + 0.01 * jax.random.normal(ks[8], (1, H), jnp.float32)
    p["ln1_b"] = 0.01 * jax.random.normal(ks[9], (1, H), jnp.float32)
    p["w1"] = std * jax.random.normal(ks[10], (H, I), jnp.float32)
    p["b1"] = 0.01 * jax.random.normal(ks[11], (1, I), jnp.float32)
    p["w2"] = std * jax.random.normal(ks[12], (I, H), jnp.float32)
    p["b2"] = 0.01 * jax.random.normal(ks[13], (1, H), jnp.float32)
    p["ln2_g"] = 1.0 + 0.01 * jax.random.normal(ks[14], (1, H), jnp.float32)
    p["ln2_b"] = 0.01 * jax.random.normal(ks[15], (1, H), jnp.float32)
    return p


def pack_layer_params(p, num_heads):
    """Host-side packing: scale folded into Q, fused KV, bf16 weights, fp32 biases/LN."""
    H = p["wq"].shape[0]
    hd = H // num_heads
    scale = 1.0 / math.sqrt(hd)
    return {
        "wq": (p["wq"] * scale).astype(jnp.bfloat16),
        "bq": p["bq"] * scale,
        "wkv": jnp.concatenate([p["wk"], p["wv"]], axis=1).astype(jnp.bfloat16),
        "bkv": jnp.concatenate([p["bk"], p["bv"]], axis=1),
        "wo": p["wo"].astype(jnp.bfloat16),
        "bo": p["bo"],
        "ln1_g": p["ln1_g"], "ln1_b": p["ln1_b"],
        "w1": p["w1"].astype(jnp.bfloat16), "b1": p["b1"],
        "w2": p["w2"].astype(jnp.bfloat16), "b2": p["b2"],
        "ln2_g": p["ln2_g"], "ln2_b": p["ln2_b"],
    }


# ----------------------------- reference ---------------------------------- #

def _reference_layer(x, p, *, num_heads, eps):
    """Pure-JAX fp32 BERT layer (post-LN), mirrors the PyTorch module."""
    B, S, H = x.shape
    hd = H // num_heads

    def ln(v, g, b):
        mu = jnp.mean(v, axis=-1, keepdims=True)
        var = jnp.mean((v - mu) ** 2, axis=-1, keepdims=True)
        return (v - mu) * jax.lax.rsqrt(var + eps) * g + b

    q = x @ p["wq"] + p["bq"]
    k = x @ p["wk"] + p["bk"]
    v = x @ p["wv"] + p["bv"]

    def split(t):
        return t.reshape(B, S, num_heads, hd).transpose(0, 2, 1, 3)

    qh, kh, vh = split(q), split(k), split(v)
    s = jnp.einsum("bhqd,bhkd->bhqk", qh, kh) / math.sqrt(hd)
    a = jax.nn.softmax(s, axis=-1)
    ctx = jnp.einsum("bhqk,bhkd->bhqd", a, vh)
    ctx = ctx.transpose(0, 2, 1, 3).reshape(B, S, H)

    attn = ctx @ p["wo"] + p["bo"]
    h1 = ln(attn + x, p["ln1_g"], p["ln1_b"])
    inter = _gelu_exact(h1 @ p["w1"] + p["b1"])
    mlp = inter @ p["w2"] + p["b2"]
    return ln(mlp + h1, p["ln2_g"], p["ln2_b"])


# ----------------------------- main ---------------------------------------- #

if __name__ == "__main__":
    # small synthetic BERT config (lane-width hidden so layouts are exercised)
    hidden_size = 128
    num_heads = 4
    intermediate_size = 256     # used by retained BertLayer
    intermediate_rank = 64      # used by SubBertLayer
    num_hidden_layers = 2
    layers_retained = {0}       # layer 0 is full BertLayer, layer 1 is SubBertLayer
    layer_norm_eps = 1e-12

    batch, seq = 2, 16

    root = jax.random.PRNGKey(0)
    key_x, key_p = jax.random.split(root)
    x = jax.random.normal(key_x, (batch, seq, hidden_size), jnp.float32)

    layer_keys = jax.random.split(key_p, num_hidden_layers)
    natural_params, packed_params = [], []
    for i in range(num_hidden_layers):
        inter = intermediate_size if i in layers_retained else intermediate_rank
        p = init_layer_params(layer_keys[i], hidden_size, inter)
        natural_params.append(p)
        packed_params.append(pack_layer_params(p, num_heads))

    out = sub_bert_encoder(x, packed_params, num_heads=num_heads,
                           eps=layer_norm_eps)
    out = jax.block_until_ready(out)
    assert out.shape == (batch, seq, hidden_size)

    # correctness check vs fp32 pure-JAX reference (bf16 MXU inputs -> loose tol)
    ref = x
    for p in natural_params:
        ref = _reference_layer(ref, p, num_heads=num_heads, eps=layer_norm_eps)
    max_err = float(jnp.max(jnp.abs(out - ref)))
    assert max_err < 7.5e-2, f"max abs error {max_err}"

    print("KERNEL_OK")
</pallas_src>

<mosaic_0001>
module attributes {stable_mosaic.version = 11 : i64} {
  func.func @bert_layer_kernel(%arg0: i32, %arg1: i32, %arg2: memref<1x16x128xf32, #tpu.memory_space<vmem>>, %arg3: memref<1x16x128xf32, #tpu.memory_space<vmem>>, %arg4: memref<128x128xbf16, #tpu.memory_space<vmem>>, %arg5: memref<1x128xf32, #tpu.memory_space<vmem>>, %arg6: memref<128x256xbf16, #tpu.memory_space<vmem>>, %arg7: memref<1x256xf32, #tpu.memory_space<vmem>>, %arg8: memref<128x128xbf16, #tpu.memory_space<vmem>>, %arg9: memref<1x128xf32, #tpu.memory_space<vmem>>, %arg10: memref<1x128xf32, #tpu.memory_space<vmem>>, %arg11: memref<1x128xf32, #tpu.memory_space<vmem>>, %arg12: memref<128x256xbf16, #tpu.memory_space<vmem>>, %arg13: memref<1x256xf32, #tpu.memory_space<vmem>>, %arg14: memref<256x128xbf16, #tpu.memory_space<vmem>>, %arg15: memref<1x128xf32, #tpu.memory_space<vmem>>, %arg16: memref<1x128xf32, #tpu.memory_space<vmem>>, %arg17: memref<1x128xf32, #tpu.memory_space<vmem>>, %arg18: memref<1x16x128xf32, #tpu.memory_space<vmem>>) attributes {dimension_semantics = [#tpu.dimension_semantics<parallel>, #tpu.dimension_semantics<parallel>], iteration_bounds = array<i64: 2, 1>, scalar_prefetch = 0 : i64, scratch_operands = 0 : i64, tpu.core_type = #tpu.core_type<tc>, window_params = [{transform_indices = @transform_0, window_bounds = array<i64: 1, 16, 128>}, {transform_indices = @transform_1, window_bounds = array<i64: 1, 16, 128>}, {pipeline_mode = #tpu.pipeline_mode<synchronous>, transform_indices = @transform_2, window_bounds = array<i64: 128, 128>}, {pipeline_mode = #tpu.pipeline_mode<synchronous>, transform_indices = @transform_3, window_bounds = array<i64: 1, 128>}, {pipeline_mode = #tpu.pipeline_mode<synchronous>, transform_indices = @transform_4, window_bounds = array<i64: 128, 256>}, {pipeline_mode = #tpu.pipeline_mode<synchronous>, transform_indices = @transform_5, window_bounds = array<i64: 1, 256>}, {pipeline_mode = #tpu.pipeline_mode<synchronous>, transform_indices = @transform_6, window_bounds = array<i64: 128, 128>}, {pipeline_mode = #tpu.pipeline_mode<synchronous>, transform_indices = @transform_7, window_bounds = array<i64: 1, 128>}, {pipeline_mode = #tpu.pipeline_mode<synchronous>, transform_indices = @transform_8, window_bounds = array<i64: 1, 128>}, {pipeline_mode = #tpu.pipeline_mode<synchronous>, transform_indices = @transform_9, window_bounds = array<i64: 1, 128>}, {pipeline_mode = #tpu.pipeline_mode<synchronous>, transform_indices = @transform_10, window_bounds = array<i64: 128, 256>}, {pipeline_mode = #tpu.pipeline_mode<synchronous>, transform_indices = @transform_11, window_bounds = array<i64: 1, 256>}, {pipeline_mode = #tpu.pipeline_mode<synchronous>, transform_indices = @transform_12, window_bounds = array<i64: 256, 128>}, {pipeline_mode = #tpu.pipeline_mode<synchronous>, transform_indices = @transform_13, window_bounds = array<i64: 1, 128>}, {pipeline_mode = #tpu.pipeline_mode<synchronous>, transform_indices = @transform_14, window_bounds = array<i64: 1, 128>}, {pipeline_mode = #tpu.pipeline_mode<synchronous>, transform_indices = @transform_15, window_bounds = array<i64: 1, 128>}, {transform_indices = @transform_16, window_bounds = array<i64: 1, 16, 128>}]} {
    %c0 = arith.constant 0 : index
    %c0_0 = arith.constant 0 : index
    %c0_1 = arith.constant 0 : index
    %0 = vector.load %arg2[%c0, %c0_0, %c0_1] : memref<1x16x128xf32, #tpu.memory_space<vmem>>, vector<1x16x128xf32>
    %1 = vector.shape_cast %0 : vector<1x16x128xf32> to vector<16x128xf32>
    %2 = arith.truncf %1 : vector<16x128xf32> to vector<16x128xbf16>
    %c0_2 = arith.constant 0 : index
    %c0_3 = arith.constant 0 : index
    %c0_4 = arith.constant 0 : index
    %3 = vector.load %arg3[%c0_2, %c0_3, %c0_4] : memref<1x16x128xf32, #tpu.memory_space<vmem>>, vector<1x16x128xf32>
    %4 = vector.shape_cast %3 : vector<1x16x128xf32> to vector<16x128xf32>
    %5 = arith.truncf %4 : vector<16x128xf32> to vector<16x128xbf16>
    %c0_5 = arith.constant 0 : index
    %c0_6 = arith.constant 0 : index
    %6 = vector.load %arg4[%c0_5, %c0_6] : memref<128x128xbf16, #tpu.memory_space<vmem>>, vector<128x128xbf16>
    %cst = arith.constant dense<0.000000e+00> : vector<16x128xf32>
    %7 = tpu.matmul %2, %6, %cst {dimension_numbers = #tpu.dot_dimension_numbers<[1], [0], [0], [1], [0, 0, 1, 1], [], []>} : vector<16x128xbf16>, vector<128x128xbf16>, vector<16x128xf32> -> vector<16x128xf32>
    %c0_7 = arith.constant 0 : index
    %c0_8 = arith.constant 0 : index
    %8 = vector.load %arg5[%c0_7, %c0_8] : memref<1x128xf32, #tpu.memory_space<vmem>>, vector<1x128xf32>
    %9 = vector.broadcast %8 : vector<1x128xf32> to vector<16x128xf32>
    %10 = arith.addf %7, %9 : vector<16x128xf32>
    %c0_9 = arith.constant 0 : index
    %c0_10 = arith.constant 0 : index
    %11 = vector.load %arg6[%c0_9, %c0_10] : memref<128x256xbf16, #tpu.memory_space<vmem>>, vector<128x256xbf16>
    %cst_11 = arith.constant dense<0.000000e+00> : vector<16x256xf32>
    %12 = tpu.matmul %5, %11, %cst_11 {dimension_numbers = #tpu.dot_dimension_numbers<[1], [0], [0], [1], [0, 0, 1, 1], [], []>} : vector<16x128xbf16>, vector<128x256xbf16>, vector<16x256xf32> -> vector<16x256xf32>
    %c0_12 = arith.constant 0 : index
    %c0_13 = arith.constant 0 : index
    %13 = vector.load %arg7[%c0_12, %c0_13] : memref<1x256xf32, #tpu.memory_space<vmem>>, vector<1x256xf32>
    %14 = vector.broadcast %13 : vector<1x256xf32> to vector<16x256xf32>
    %15 = arith.addf %12, %14 : vector<16x256xf32>
    %16 = arith.truncf %10 : vector<16x128xf32> to vector<16x128xbf16>
    %17 = vector.shape_cast %16 : vector<16x128xbf16> to vector<16x4x32xbf16>
    %18 = tpu.transpose %17, [1, 0, 2] : vector<16x4x32xbf16> -> vector<4x16x32xbf16>
    %19 = arith.truncf %15 : vector<16x256xf32> to vector<16x256xbf16>
    %20 = vector.extract_strided_slice %19 {offsets = [0, 0], sizes = [16, 128], strides = [1, 1]} : vector<16x256xbf16> to vector<16x128xbf16>
    %21 = vector.shape_cast %20 : vector<16x128xbf16> to vector<16x4x32xbf16>
    %22 = tpu.transpose %21, [1, 0, 2] : vector<16x4x32xbf16> -> vector<4x16x32xbf16>
    %23 = vector.extract_strided_slice %19 {offsets = [0, 128], sizes = [16, 128], strides = [1, 1]} : vector<16x256xbf16> to vector<16x128xbf16>
    %24 = vector.shape_cast %23 : vector<16x128xbf16> to vector<16x4x32xbf16>
    %25 = tpu.transpose %24, [1, 0, 2] : vector<16x4x32xbf16> -> vector<4x16x32xbf16>
    "tpu.trace_start"() <{level = 10 : i32, message = "hqd,hkd->hqk"}> : () -> ()
    %cst_14 = arith.constant dense<0.000000e+00> : vector<4x16x16xf32>
    %26 = tpu.matmul %18, %22, %cst_14 {dimension_numbers = #tpu.dot_dimension_numbers<[2], [2], [1], [1], [0, 0, 0, 1, 1, 1], [0], [0]>} : vector<4x16x32xbf16>, vector<4x16x32xbf16>, vector<4x16x16xf32> -> vector<4x16x16xf32>
    "tpu.trace_stop"() : () -> ()
    %cst_15 = arith.constant dense<0xFF800000> : vector<4x16xf32>
    %27 = vector.multi_reduction <maximumf>, %26, %cst_15 [2] : vector<4x16x16xf32> to vector<4x16xf32>
    %28 = vector.shape_cast %27 : vector<4x16xf32> to vector<4x16x1xf32>
    %29 = vector.broadcast %28 : vector<4x16x1xf32> to vector<4x16x16xf32>
    %30 = arith.subf %26, %29 : vector<4x16x16xf32>
    %31 = math.exp %30 : vector<4x16x16xf32>
    %cst_16 = arith.constant dense<0.000000e+00> : vector<4x16xf32>
    %32 = vector.multi_reduction <add>, %31, %cst_16 [2] : vector<4x16x16xf32> to vector<4x16xf32>
    %33 = vector.shape_cast %32 : vector<4x16xf32> to vector<4x16x1xf32>
    %34 = tpu.reciprocal %33 {approx = true} : vector<4x16x1xf32> -> vector<4x16x1xf32>
    %35 = vector.broadcast %34 : vector<4x16x1xf32> to vector<4x16x16xf32>
    %36 = arith.mulf %31, %35 : vector<4x16x16xf32>
    %37 = arith.truncf %36 : vector<4x16x16xf32> to vector<4x16x16xbf16>
    "tpu.trace_start"() <{level = 10 : i32, message = "hqk,hkd->hqd"}> : () -> ()
    %cst_17 = arith.constant dense<0.000000e+00> : vector<4x16x32xf32>
    %38 = tpu.matmul %37, %25, %cst_17 {dimension_numbers = #tpu.dot_dimension_numbers<[2], [1], [1], [2], [0, 0, 0, 1, 1, 2], [0], [0]>} : vector<4x16x16xbf16>, vector<4x16x32xbf16>, vector<4x16x32xf32> -> vector<4x16x32xf32>
    "tpu.trace_stop"() : () -> ()
    %39 = tpu.transpose %38, [1, 0, 2] : vector<4x16x32xf32> -> vector<16x4x32xf32>
    %40 = vector.shape_cast %39 : vector<16x4x32xf32> to vector<16x128xf32>
    %41 = arith.truncf %40 : vector<16x128xf32> to vector<16x128xbf16>
    %c0_18 = arith.constant 0 : index
    %c0_19 = arith.constant 0 : index
    %42 = vector.load %arg8[%c0_18, %c0_19] : memref<128x128xbf16, #tpu.memory_space<vmem>>, vector<128x128xbf16>
    %cst_20 = arith.constant dense<0.000000e+00> : vector<16x128xf32>
    %43 = tpu.matmul %41, %42, %cst_20 {dimension_numbers = #tpu.dot_dimension_numbers<[1], [0], [0], [1], [0, 0, 1, 1], [], []>} : vector<16x128xbf16>, vector<128x128xbf16>, vector<16x128xf32> -> vector<16x128xf32>
    %c0_21 = arith.constant 0 : index
    %c0_22 = arith.constant 0 : index
    %44 = vector.load %arg9[%c0_21, %c0_22] : memref<1x128xf32, #tpu.memory_space<vmem>>, vector<1x128xf32>
    %45 = vector.broadcast %44 : vector<1x128xf32> to vector<16x128xf32>
    %46 = arith.addf %43, %45 : vector<16x128xf32>
    %47 = arith.addf %46, %1 : vector<16x128xf32>
    %c0_23 = arith.constant 0 : index
    %c0_24 = arith.constant 0 : index
    %48 = vector.load %arg10[%c0_23, %c0_24] : memref<1x128xf32, #tpu.memory_space<vmem>>, vector<1x128xf32>
    %c0_25 = arith.constant 0 : index
    %c0_26 = arith.constant 0 : index
    %49 = vector.load %arg11[%c0_25, %c0_26] : memref<1x128xf32, #tpu.memory_space<vmem>>, vector<1x128xf32>
    %cst_27 = arith.constant dense<0.000000e+00> : vector<16xf32>
    %50 = vector.multi_reduction <add>, %47, %cst_27 [1] : vector<16x128xf32> to vector<16xf32>
    %51 = vector.shape_cast %50 : vector<16xf32> to vector<16x1xf32>
    %cst_28 = arith.constant 1.280000e+02 : f32
    %52 = vector.broadcast %cst_28 : f32 to vector<16x1xf32>
    %53 = arith.divf %51, %52 : vector<16x1xf32>
    %54 = vector.broadcast %53 : vector<16x1xf32> to vector<16x128xf32>
    %55 = arith.subf %47, %54 : vector<16x128xf32>
    %56 = arith.mulf %55, %55 : vector<16x128xf32>
    %cst_29 = arith.constant dense<0.000000e+00> : vector<16xf32>
    %57 = vector.multi_reduction <add>, %56, %cst_29 [1] : vector<16x128xf32> to vector<16xf32>
    %58 = vector.shape_cast %57 : vector<16xf32> to vector<16x1xf32>
    %cst_30 = arith.constant 1.280000e+02 : f32
    %59 = vector.broadcast %cst_30 : f32 to vector<16x1xf32>
    %60 = arith.divf %58, %59 : vector<16x1xf32>
    %61 = vector.broadcast %53 : vector<16x1xf32> to vector<16x128xf32>
    %62 = arith.subf %47, %61 : vector<16x128xf32>
    %cst_31 = arith.constant 9.99999996E-13 : f32
    %63 = vector.broadcast %cst_31 : f32 to vector<16x1xf32>
    %64 = arith.addf %60, %63 : vector<16x1xf32>
    %65 = math.rsqrt %64 : vector<16x1xf32>
    %66 = vector.broadcast %65 : vector<16x1xf32> to vector<16x128xf32>
    %67 = arith.mulf %62, %66 : vector<16x128xf32>
    %68 = vector.broadcast %48 : vector<1x128xf32> to vector<16x128xf32>
    %69 = arith.mulf %67, %68 : vector<16x128xf32>
    %70 = vector.broadcast %49 : vector<1x128xf32> to vector<16x128xf32>
    %71 = arith.addf %69, %70 : vector<16x128xf32>
    %72 = arith.truncf %71 : vector<16x128xf32> to vector<16x128xbf16>
    %c0_32 = arith.constant 0 : index
    %c0_33 = arith.constant 0 : index
    %73 = vector.load %arg12[%c0_32, %c0_33] : memref<128x256xbf16, #tpu.memory_space<vmem>>, vector<128x256xbf16>
    %cst_34 = arith.constant dense<0.000000e+00> : vector<16x256xf32>
    %74 = tpu.matmul %72, %73, %cst_34 {dimension_numbers = #tpu.dot_dimension_numbers<[1], [0], [0], [1], [0, 0, 1, 1], [], []>} : vector<16x128xbf16>, vector<128x256xbf16>, vector<16x256xf32> -> vector<16x256xf32>
    %c0_35 = arith.constant 0 : index
    %c0_36 = arith.constant 0 : index
    %75 = vector.load %arg13[%c0_35, %c0_36] : memref<1x256xf32, #tpu.memory_space<vmem>>, vector<1x256xf32>
    %76 = vector.broadcast %75 : vector<1x256xf32> to vector<16x256xf32>
    %77 = arith.addf %74, %76 : vector<16x256xf32>
    %cst_37 = arith.constant 5.000000e-01 : f32
    %78 = vector.broadcast %cst_37 : f32 to vector<16x256xf32>
    %79 = arith.mulf %78, %77 : vector<16x256xf32>
    %cst_38 = arith.constant 0.707106769 : f32
    %80 = vector.broadcast %cst_38 : f32 to vector<16x256xf32>
    %81 = arith.mulf %77, %80 : vector<16x256xf32>
    %82 = math.erf %81 : vector<16x256xf32>
    %cst_39 = arith.constant 1.000000e+00 : f32
    %83 = vector.broadcast %cst_39 : f32 to vector<16x256xf32>
    %84 = arith.addf %83, %82 : vector<16x256xf32>
    %85 = arith.mulf %79, %84 : vector<16x256xf32>
    %86 = arith.truncf %85 : vector<16x256xf32> to vector<16x256xbf16>
    %c0_40 = arith.constant 0 : index
    %c0_41 = arith.constant 0 : index
    %87 = vector.load %arg14[%c0_40, %c0_41] : memref<256x128xbf16, #tpu.memory_space<vmem>>, vector<256x128xbf16>
    %cst_42 = arith.constant dense<0.000000e+00> : vector<16x128xf32>
    %88 = tpu.matmul %86, %87, %cst_42 {dimension_numbers = #tpu.dot_dimension_numbers<[1], [0], [0], [1], [0, 0, 1, 1], [], []>} : vector<16x256xbf16>, vector<256x128xbf16>, vector<16x128xf32> -> vector<16x128xf32>
    %c0_43 = arith.constant 0 : index
    %c0_44 = arith.constant 0 : index
    %89 = vector.load %arg15[%c0_43, %c0_44] : memref<1x128xf32, #tpu.memory_space<vmem>>, vector<1x128xf32>
    %90 = vector.broadcast %89 : vector<1x128xf32> to vector<16x128xf32>
    %91 = arith.addf %88, %90 : vector<16x128xf32>
    %92 = arith.addf %91, %71 : vector<16x128xf32>
    %c0_45 = arith.constant 0 : index
    %c0_46 = arith.constant 0 : index
    %93 = vector.load %arg16[%c0_45, %c0_46] : memref<1x128xf32, #tpu.memory_space<vmem>>, vector<1x128xf32>
    %c0_47 = arith.constant 0 : index
    %c0_48 = arith.constant 0 : index
    %94 = vector.load %arg17[%c0_47, %c0_48] : memref<1x128xf32, #tpu.memory_space<vmem>>, vector<1x128xf32>
    %cst_49 = arith.constant dense<0.000000e+00> : vector<16xf32>
    %95 = vector.multi_reduction <add>, %92, %cst_49 [1] : vector<16x128xf32> to vector<16xf32>
    %96 = vector.shape_cast %95 : vector<16xf32> to vector<16x1xf32>
    %cst_50 = arith.constant 1.280000e+02 : f32
    %97 = vector.broadcast %cst_50 : f32 to vector<16x1xf32>
    %98 = arith.divf %96, %97 : vector<16x1xf32>
    %99 = vector.broadcast %98 : vector<16x1xf32> to vector<16x128xf32>
    %100 = arith.subf %92, %99 : vector<16x128xf32>
    %101 = arith.mulf %100, %100 : vector<16x128xf32>
    %cst_51 = arith.constant dense<0.000000e+00> : vector<16xf32>
    %102 = vector.multi_reduction <add>, %101, %cst_51 [1] : vector<16x128xf32> to vector<16xf32>
    %103 = vector.shape_cast %102 : vector<16xf32> to vector<16x1xf32>
    %cst_52 = arith.constant 1.280000e+02 : f32
    %104 = vector.broadcast %cst_52 : f32 to vector<16x1xf32>
    %105 = arith.divf %103, %104 : vector<16x1xf32>
    %106 = vector.broadcast %98 : vector<16x1xf32> to vector<16x128xf32>
    %107 = arith.subf %92, %106 : vector<16x128xf32>
    %cst_53 = arith.constant 9.99999996E-13 : f32
    %108 = vector.broadcast %cst_53 : f32 to vector<16x1xf32>
    %109 = arith.addf %105, %108 : vector<16x1xf32>
    %110 = math.rsqrt %109 : vector<16x1xf32>
    %111 = vector.broadcast %110 : vector<16x1xf32> to vector<16x128xf32>
    %112 = arith.mulf %107, %111 : vector<16x128xf32>
    %113 = vector.broadcast %93 : vector<1x128xf32> to vector<16x128xf32>
    %114 = arith.mulf %112, %113 : vector<16x128xf32>
    %115 = vector.broadcast %94 : vector<1x128xf32> to vector<16x128xf32>
    %116 = arith.addf %114, %115 : vector<16x128xf32>
    %c0_54 = arith.constant 0 : index
    %c0_55 = arith.constant 0 : index
    %c0_56 = arith.constant 0 : index
    %117 = vector.load %arg18[%c0_54, %c0_55, %c0_56] : memref<1x16x128xf32, #tpu.memory_space<vmem>>, vector<1x16x128xf32>
    %118 = vector.shape_cast %117 : vector<1x16x128xf32> to vector<16x128xf32>
    %119 = vector.shape_cast %116 : vector<16x128xf32> to vector<1x16x128xf32>
    tpu.vector_store %arg18[%c0_54, %c0_55, %c0_56], %119 {strides = array<i32>} : memref<1x16x128xf32, #tpu.memory_space<vmem>>, vector<1x16x128xf32>,
    return
  }
  func.func @transform_0(%arg0: i32, %arg1: i32) -> (i32, i32, i32) {
    %c0_i32 = arith.constant 0 : i32
    %c0_i32_0 = arith.constant 0 : i32
    return %arg0, %arg1, %c0_i32 : i32, i32, i32
  }
  func.func @transform_1(%arg0: i32, %arg1: i32) -> (i32, i32, i32) {
    %c0_i32 = arith.constant 0 : i32
    %c0_i32_0 = arith.constant 0 : i32
    %c0_i32_1 = arith.constant 0 : i32
    return %arg0, %c0_i32, %c0_i32_0 : i32, i32, i32
  }
  func.func @transform_2(%arg0: i32, %arg1: i32) -> (i32, i32) {
    %c0_i32 = arith.constant 0 : i32
    %c0_i32_0 = arith.constant 0 : i32
    %c0_i32_1 = arith.constant 0 : i32
    return %c0_i32, %c0_i32_0 : i32, i32
  }
  func.func @transform_3(%arg0: i32, %arg1: i32) -> (i32, i32) {
    %c0_i32 = arith.constant 0 : i32
    %c0_i32_0 = arith.constant 0 : i32
    %c0_i32_1 = arith.constant 0 : i32
    return %c0_i32, %c0_i32_0 : i32, i32
  }
  func.func @transform_4(%arg0: i32, %arg1: i32) -> (i32, i32) {
    %c0_i32 = arith.constant 0 : i32
    %c0_i32_0 = arith.constant 0 : i32
    %c0_i32_1 = arith.constant 0 : i32
    return %c0_i32, %c0_i32_0 : i32, i32
  }
  func.func @transform_5(%arg0: i32, %arg1: i32) -> (i32, i32) {
    %c0_i32 = arith.constant 0 : i32
    %c0_i32_0 = arith.constant 0 : i32
    %c0_i32_1 = arith.constant 0 : i32
    return %c0_i32, %c0_i32_0 : i32, i32
  }
  func.func @transform_6(%arg0: i32, %arg1: i32) -> (i32, i32) {
    %c0_i32 = arith.constant 0 : i32
    %c0_i32_0 = arith.constant 0 : i32
    %c0_i32_1 = arith.constant 0 : i32
    return %c0_i32, %c0_i32_0 : i32, i32
  }
  func.func @transform_7(%arg0: i32, %arg1: i32) -> (i32, i32) {
    %c0_i32 = arith.constant 0 : i32
    %c0_i32_0 = arith.constant 0 : i32
    %c0_i32_1 = arith.constant 0 : i32
    return %c0_i32, %c0_i32_0 : i32, i32
  }
  func.func @transform_8(%arg0: i32, %arg1: i32) -> (i32, i32) {
    %c0_i32 = arith.constant 0 : i32
    %c0_i32_0 = arith.constant 0 : i32
    %c0_i32_1 = arith.constant 0 : i32
    return %c0_i32, %c0_i32_0 : i32, i32
  }
  func.func @transform_9(%arg0: i32, %arg1: i32) -> (i32, i32) {
    %c0_i32 = arith.constant 0 : i32
    %c0_i32_0 = arith.constant 0 : i32
    %c0_i32_1 = arith.constant 0 : i32
    return %c0_i32, %c0_i32_0 : i32, i32
  }
  func.func @transform_10(%arg0: i32, %arg1: i32) -> (i32, i32) {
    %c0_i32 = arith.constant 0 : i32
    %c0_i32_0 = arith.constant 0 : i32
    %c0_i32_1 = arith.constant 0 : i32
    return %c0_i32, %c0_i32_0 : i32, i32
  }
  func.func @transform_11(%arg0: i32, %arg1: i32) -> (i32, i32) {
    %c0_i32 = arith.constant 0 : i32
    %c0_i32_0 = arith.constant 0 : i32
    %c0_i32_1 = arith.constant 0 : i32
    return %c0_i32, %c0_i32_0 : i32, i32
  }
  func.func @transform_12(%arg0: i32, %arg1: i32) -> (i32, i32) {
    %c0_i32 = arith.constant 0 : i32
    %c0_i32_0 = arith.constant 0 : i32
    %c0_i32_1 = arith.constant 0 : i32
    return %c0_i32, %c0_i32_0 : i32, i32
  }
  func.func @transform_13(%arg0: i32, %arg1: i32) -> (i32, i32) {
    %c0_i32 = arith.constant 0 : i32
    %c0_i32_0 = arith.constant 0 : i32
    %c0_i32_1 = arith.constant 0 : i32
    return %c0_i32, %c0_i32_0 : i32, i32
  }
  func.func @transform_14(%arg0: i32, %arg1: i32) -> (i32, i32) {
    %c0_i32 = arith.constant 0 : i32
    %c0_i32_0 = arith.constant 0 : i32
    %c0_i32_1 = arith.constant 0 : i32
    return %c0_i32, %c0_i32_0 : i32, i32
  }
  func.func @transform_15(%arg0: i32, %arg1: i32) -> (i32, i32) {
    %c0_i32 = arith.constant 0 : i32
    %c0_i32_0 = arith.constant 0 : i32
    %c0_i32_1 = arith.constant 0 : i32
    return %c0_i32, %c0_i32_0 : i32, i32
  }
  func.func @transform_16(%arg0: i32, %arg1: i32) -> (i32, i32, i32) {
    %c0_i32 = arith.constant 0 : i32
    %c0_i32_0 = arith.constant 0 : i32
    return %arg0, %arg1, %c0_i32 : i32, i32, i32
  }
}

</mosaic_0001>

<bundles_post_ra>
// kernel: tpu_custom_call.1
= control target key start
LH: loop header
LB: loop body
LE: loop exit
PB: predicated region body
PF: predicated region fallthrough
CT: control target
= control target key end

     0   :  { %s5093_s0 = inlined_call_operand.hbm [shape: f32[2,16,128], index: 0, kind: input, shape index: {}]   ;;  %s5094_s1 = inlined_call_operand.hbm [shape: f32[2,16,128], index: 1, kind: input, shape index: {}]   ;;  %s5095_s2 = inlined_call_operand.hbm [shape: bf16[128,128], index: 2, kind: input, shape index: {}]   ;;  %s5096_s3 = inlined_call_operand.hbm [shape: f32[1,128], index: 3, kind: input, shape index: {}]   ;;  %s5097_s4 = inlined_call_operand.hbm [shape: bf16[128,256], index: 4, kind: input, shape index: {}]   ;;  %s5098_s5 = inlined_call_operand.vmem [shape: f32[1,256], index: 5, kind: input, shape index: {}]   ;;  %s5099_s6 = inlined_call_operand.hbm [shape: bf16[128,128], index: 6, kind: input, shape index: {}]   ;;  %s5100_s7 = inlined_call_operand.vmem [shape: f32[1,128], index: 7, kind: input, shape index: {}]   ;;  %s5101_s8 = inlined_call_operand.vmem [shape: f32[1,128], index: 8, kind: input, shape index: {}]   ;;  %s5102_s9 = inlined_call_operand.vmem [shape: f32[1,128], index: 9, kind: input, shape index: {}]   ;;  %s5103_s10 = inlined_call_operand.hbm [shape: bf16[128,256], index: 10, kind: input, shape index: {}]   ;;  %s5104_s11 = inlined_call_operand.vmem [shape: f32[1,256], index: 11, kind: input, shape index: {}]   ;;  %s5105_s12 = inlined_call_operand.hbm [shape: bf16[256,128], index: 12, kind: input, shape index: {}]   ;;  %s5106_s13 = inlined_call_operand.vmem [shape: f32[1,128], index: 13, kind: input, shape index: {}]   ;;  %s5107_s14 = inlined_call_operand.vmem [shape: f32[1,128], index: 14, kind: input, shape index: {}]   ;;  %s5108_s15 = inlined_call_operand.vmem [shape: f32[1,128], index: 15, kind: input, shape index: {}]   ;;  %s5109_s16 = inlined_call_operand.hbm [shape: f32[2,16,128], index: 16, kind: output, shape index: {}]  }
   0x1   :  { %5119 = sst [smem:[#allocation30_spill]] %s5093_s0 }
   0x2   :  { %5120 = sst [smem:[#allocation31_spill]] %s5095_s2 }
   0x3   :  { %5121 = sst [smem:[#allocation32_spill]] %s5096_s3 }
   0x4   :  { %5122 = sst [smem:[#allocation33_spill]] %s5097_s4 }
   0x5   :  { %5123 = sst [smem:[#allocation34_spill]] %s5099_s6 }
   0x6   :  { %5124 = sst [smem:[#allocation35_spill]] %s5102_s9 }
   0x7   :  { %5125 = sst [smem:[#allocation36_spill]] %s5103_s10 }
   0x8   :  { %5126 = sst [smem:[#allocation37_spill]] %s5104_s11 }
   0x9   :  { %5127 = sst [smem:[#allocation38_spill]] %s5105_s12 }
   0xa   :  { %5128 = sst [smem:[#allocation39_spill]] %s5106_s13 }
   0xb   :  { %5129 = sst [smem:[#allocation40_spill]] %s5107_s14 }
   0xc   :  { %5130 = sst [smem:[#allocation41_spill]] %s5108_s15 }
   0xd   :  { %5131 = sst [smem:[#allocation42_spill]] %s5109_s16 }
   0xe   :  { %21 = vsyncpa [#allocation3], 0 }
   0xf   :  { %23 = vsyncpa [#allocation3 + $0x1], 0 }
  0x10   :  { %24 = vsyncpa [#allocation6], 0 }
  0x11   :  { %26 = vsyncpa [#allocation6 + $0x1], 0 }
  0x12   :  { %27 = vsyncpa [#allocation9], 0 }
  0x13   :  { %28 = vsyncpa [#allocation12], 0 }
  0x14   :  { %29 = vsyncpa [#allocation15], 0 }
  0x15   :  { %30 = vsyncpa [#allocation4], 0 }
  0x16   :  { %32 = vsyncpa [#allocation4 + $0x1], 0  ;;  %s4085_s21 = smov 0   ;;  %s4087_s22 = smov 0  }
  0x17   :  { %s4089_s23 = smov 0   ;;  %s4091_s24 = smov 0  }
  0x18   :  { %s4093_s25 = smov 0   ;;  %s4095_s26 = smov 0  }
  0x19 LB: > { %5132 = sst [smem:[#allocation24_spill]] %s3968_s23  ;;  %s4116_s27 = sadd.s32 4294967295, %s3980_s26   ;;  %s3980_s26 = sphi %s4095_s26, %s38_s26   ;;  %s3976_s25 = sphi %s4093_s25, %s5168_s25   ;;  %s3972_s24 = sphi %s4091_s24, %s5167_s24   ;;  %s3968_s23 = sphi %s4089_s23, %s5166_s23   ;;  %s3964_s22 = sphi %s4087_s22, %s5170_s22   ;;  %s3960_s21 = sphi %s4085_s21, %s5169_s21  }
  0x1a   : > { %5133 = sst [smem:[#allocation25_spill]] %s3972_s24  ;;  %p3060_p0 = scmp.ge.s32.totalorder %s3980_s26, 1 }
  0x1b   : > { %5134 = sst [smem:[#allocation26_spill]] %s3976_s25  ;;  %p73_p1 = scmp.eq.s32.totalorder %s4116_s27, 0 }
  0x1c   : > { %p431_p2 = scmp.lt.s32.totalorder %s3980_s26, 3  ;;  %s5135_s2 = sld [smem:[#allocation31_spill]] }
  0x1d   : > { %s3982_s17 = smov [#allocation7]   ;;  %p3067_p6 = scmp.ge.s32.totalorder %s3980_s26, 2 }
  0x1e   : > { %p4124_p3 = pnand %p3060_p0, %p431_p2  ;;  %s444_s18 = sshll.u32 %s3982_s17, 4  ;;  %s445_s18 = int_to_ptr.vmem [resolvable:$true] %s444_s18 }
  0x1f   : > { %s5138_s3 = sld [smem:[#allocation32_spill]]  ;;  %s3984_s16 = smov 4  }
  0x20   : > { %p3454_p4 = pneg %p4124_p3  ;;  %s3985_s17 = smov [#allocation8]  }
  0x21   : > { %s459_s15 = sshll.u32 %s3985_s17, 4  ;;  %s5139_s6 = sld [smem:[#allocation34_spill]]  ;;  %s460_s15 = int_to_ptr.vmem [resolvable:$true] %s459_s15 }
  0x22   : > { %s442_s30 = sshll.u32 %s5135_s2, 4  ;;  %p4132_p5 = pnand %p3454_p4, %p73_p1  ;;  %s443_s30 = int_to_ptr.hbm [resolvable:$true] %s442_s30 }
  0x23   : > { %s3983_s2 = smov 64   ;;  %s5140_s4 = sld [smem:[#allocation33_spill]] }
  0x24   : > { %3457 = dma.hbm_to_vmem [thread:$0]  (!%p4132_p5), %s443_s30, 1024, %s445_s18, [#allocation6], %s3983_s2, %s3983_s2, %s3984_s16  }
  0x25   : > { %s457_s29 = sshll.u32 %s5138_s3, 4  ;;  %s3986_s11 = smov [#allocation11]   ;;  %s458_s29 = int_to_ptr.hbm [resolvable:$true] %s457_s29 }
  0x26   : > { %3460 = dma.hbm_to_vmem [thread:$0]  (!%p4132_p5), %s458_s29, 16, %s460_s15, [#allocation9]  }
  0x27   : > { %s485_s13 = sshll.u32 %s5139_s6, 4  ;;  %s487_s9 = sshll.u32 %s3986_s11, 4  ;;  %s486_s13 = int_to_ptr.hbm [resolvable:$true] %s485_s13  ;;  %s488_s9 = int_to_ptr.vmem [resolvable:$true] %s487_s9 }
  0x28   : > { %3466 = dma.hbm_to_vmem [thread:$0]  (!%p4132_p5), %s486_s13, 1024, %s488_s9, [#allocation12], %s3983_s2, %s3983_s2, %s3984_s16  }
  0x29   : > { %s468_s3 = sshll.u32 %s5140_s4, 4  ;;  %s3987_s14 = smov [#allocation10]   ;;  %s469_s3 = int_to_ptr.hbm [resolvable:$true] %s468_s3 }
  0x2a   : > { %s470_s24 = sshll.u32 %s3987_s14, 4  ;;  %s5111_s15 = smov 128   ;;  %s471_s24 = int_to_ptr.vmem [resolvable:$true] %s470_s24 }
  0x2b   : > { %s5113_s30 = smov 8   ;;  %s5141_s10 = sld [smem:[#allocation36_spill]] }
  0x2c   : > { %3463 = dma.hbm_to_vmem [thread:$0]  (!%p4132_p5), %s469_s3, 2048, %s471_s24, [#allocation9], %s5111_s15, %s5111_s15, %s5113_s30  }
  0x2d   : > { %s3990_s9 = smov [#allocation13]   ;;  %s5142_s12 = sld [smem:[#allocation38_spill]] }
  0x2e   : > { %s510_s13 = sshll.u32 %s3990_s9, 4  ;;  %s3991_s3 = smov [#allocation14]   ;;  %s511_s13 = int_to_ptr.vmem [resolvable:$true] %s510_s13 }
  0x2f   : > { %s527_s14 = sshll.u32 %s3991_s3, 4  ;;  %s3059_s24 = sadd.s32 4294967294, %s3980_s26   ;;  %s528_s14 = int_to_ptr.vmem [resolvable:$true] %s527_s14 }
  0x30   : > { %s50_s11 = sadd.s32 1, %s3976_s25  ;;  %s59_s18 = sadd.s32 1, %s3968_s23 }
  0x31   : > { %s508_s29 = sshll.u32 %s5141_s10, 4  ;;  %p52_p7 = scmp.ge.s32.totalorder %s50_s11, 2  ;;  %s509_s29 = int_to_ptr.hbm [resolvable:$true] %s508_s29 }
  0x32   : > { %3469 = dma.hbm_to_vmem [thread:$0]  (!%p4132_p5), %s509_s29, 2048, %s511_s13, [#allocation12], %s5111_s15, %s5111_s15, %s5113_s30  }
  0x33   : > { %s525_s28 = sshll.u32 %s5142_s12, 4  ;;  %p66_p8 = scmp.ne.s32.totalorder %s3968_s23, %s3964_s22  ;;  %s526_s28 = int_to_ptr.hbm [resolvable:$true] %s525_s28 }
  0x34   : > { %3472 = dma.hbm_to_vmem [thread:$0]  (!%p4132_p5), %s526_s28, 2048, %s528_s14, [#allocation15], %s3983_s2, %s3983_s2, %s3984_s16  }
  0x35   : > { %p67_p9 = scmp.eq.s32.totalorder %s3980_s26, 0  ;;  %s5172_s11 = smov (%p52_p7, %s50_s11), 0 }
  0x36   : > { %5143 = sst [smem:[#allocation27_spill]] %s5172_s11  ;;  %p72_p11 = scmp.ne.s32.totalorder %s3964_s22, %s3960_s21 }
  0x37   : > { %p4187_p10 = por %p67_p9, %p66_p8  ;;  %s54_s19 = ssub.s32 %s3976_s25, %s5172_s11 }
  0x38   : > { %p418_p12 = scmp.eq.s32.totalorder %s4116_s27, 1  ;;  %p57_p13 = scmp.eq.s32.totalorder %s54_s19, 0 }
  0x39   : > { %p4198_p0 = por %p73_p1, %p72_p11  ;;  %p424_p4 = scmp.eq.s32.totalorder %s3059_s24, 1 }
  0x3a   : > { %p4202_p2 = por %p418_p12, %p66_p8  ;;  %p3490_p7 = scmp.lt.s32.totalorder %s3980_s26, 2 }
  0x3b   : > { %s4207_s9 = scalar_select %p57_p13, %s3968_s23, %s59_s18  }
  0x3c   : > { %p4209_p5 = por %p424_p4, %p72_p11  ;;  %s550_s17 = sand.u32 1, %s3968_s23  }
  0x3d   : > { %5147 = sst [smem:[#allocation28_spill]] %s4207_s9  ;;  %s3357_s20 = sshll.u32 %s3976_s25, 4 }
  0x3e   : > { %s5148_s13 = scalar_select %p4209_p5, 1, 0 }
  0x3f   : > { %s3068_s28 = sshll.u32 %s550_s17, 4  ;;  %s5150_s19 = sld [smem:[#allocation30_spill]] }
  0x40   : > { %5149 = sst [smem:[#allocation29_spill]] %s5148_s13  ;;  %s554_s4 = scalar_lea.vmem [#allocation2], %s3068_s28 }
  0x41   : > { %s564_s6 = sshll.u32 %s554_s4, 4  ;;  %p3474_p8 = pnand %p3490_p7, %p4187_p10  ;;  %s565_s6 = int_to_ptr.vmem [resolvable:$true] %s564_s6 }
  0x42   : > { %s583_s10 = scalar_lea.hbm %s5094_s1, %s3357_s20  ;;  %s578_s12 = scalar_lea.vmem [#allocation5], %s3068_s28 }
  0x43   : > { %s586_s11 = sshll.u32 %s578_s12, 4  ;;  %s584_s25 = sshll.u32 %s583_s10, 4  ;;  %s585_s25 = int_to_ptr.hbm [resolvable:$true] %s584_s25  ;;  %s587_s11 = int_to_ptr.vmem [resolvable:$true] %s586_s11 }
  0x44   : > { %s551_s9 = scalar_lea.sflag [#allocation3], %s550_s17  ;;  %s5151_s23 = smov 8  }
  0x45   : > { %s561_s15 = scalar_lea.hbm %s5150_s19, %s3357_s20  ;;  %s5152_s13 = smov 128  }
  0x46   : > { %s562_s30 = sshll.u32 %s561_s15, 4  ;;  %s574_s15 = sand.u32 1, %s3980_s26   ;;  %s563_s30 = int_to_ptr.hbm [resolvable:$true] %s562_s30 }
  0x47   : > { %3476 = dma.hbm_to_vmem [thread:$0]  (!%p3474_p8), %s563_s30, 256, %s565_s6, %s551_s9, %s5152_s13, %s5152_s13, %s5151_s23  }
  0x48   : > { %s575_s4 = scalar_lea.sflag [#allocation6], %s574_s15  ;;  %598 = sbr.rel (%p4124_p3) target bundleno = 2209 (0x8a1), region = 84 }
  0x49   : > { %3479 = dma.hbm_to_vmem [thread:$0]  (!%p3474_p8), %s585_s25, 256, %s587_s11, %s575_s4, %s5152_s13, %s5152_s13, %s5151_s23  }
  0x4a   : > { %s4234_s12 = sand.u32 (!%p4124_p3), 1, %s3964_s22  }
  0x4b   : > { %s4237_s10 = sshll.u32 (!%p4124_p3), %s4234_s12, 4  ;;  %s601_s6 = scalar_lea.sflag (!%p4124_p3), [#allocation3], %s4234_s12 }
  0x4c   : > { %s4241_s30 = scalar_lea.vmem (!%p4124_p3), [#allocation2], %s4237_s10 }
  0x4d   : > { %3931 = dma.done.wait (%p4198_p0), %s601_s6, 256  }
  0x4e   : > { %3933 = vsyncadd (%p4198_p0), %s601_s6, 4294967040  ;;  %s610_s23 = sand.u32 1, %s4116_s27   ;;  %s614_s0 = scalar_lea.vmem [#allocation5], %s4237_s10 }
  0x4f   : > { %s611_s25 = scalar_lea.sflag [#allocation6], %s610_s23 }
  0x50   : > { %3935 = dma.done.wait (%p4198_p0), %s611_s25, 256  }
  0x51   : > { %3937 = vsyncadd (%p4198_p0), %s611_s25, 4294967040 }
  0x52   : > { %3939 = dma.done.wait (%p73_p1), [#allocation6], 1024  }
  0x53   : > { %3941 = vsyncadd (%p73_p1), [#allocation6], 4294966272 }
  0x54   : > { %3943 = dma.done.wait (%p73_p1), [#allocation9], 2064  }
  0x55   : > { %3945 = vsyncadd (%p73_p1), [#allocation9], 4294965232 }
  0x56   : > { %3947 = dma.done.wait (%p73_p1), [#allocation12], 3072  }
  0x57   : > { %3949 = vsyncadd (%p73_p1), [#allocation12], 4294964224 }
  0x58   : > { %3951 = dma.done.wait (%p73_p1), [#allocation15], 2048  }
  0x59   : > { %3953 = vsyncadd (%p73_p1), [#allocation15], 4294965248  ;;  %v3366_v0 = vld [vmem:[#allocation7 + $0x38] sm:$0xff]  ;;  %v3174_v1 = vld [vmem:[#allocation10 + $0x70] sm:$0xf]  ;;  %s3992_s29 = smov 32  }
  0x5a   : > { %v3382_v2 = vld [vmem:[#allocation10 + $0x74] sm:$0xf0]  ;;  %v3381_v4 = vld [vmem:[#allocation10 + $0x74] sm:$0xf]  ;;  %v3176_v5 = vld [vmem:[#allocation10 + $0x78] sm:$0xf0]  ;;  %776 = vmatpush.bf16.msra.mxu0 %v3366_v0 }
  0x5b   : > { %v3175_v3 = vor.u32 %v3382_v2, %v3174_v1  ;;  %v3365_v6 = vld [vmem:[#allocation7 + $0x30] sm:$0xff]  ;;  %v3179_v7 = vor.u32 %v3381_v4, %v3176_v5  ;;  %v3166_v8 = vld [vmem:[#allocation10 + $0x60] sm:$0xf]  ;;  %v3380_v9 = vld [vmem:[#allocation10 + $0x64] sm:$0xf0]  ;;  %s3993_s2 = smov 64  }
  0x5c   : > { %v3379_v10 = vld [vmem:[#allocation10 + $0x64] sm:$0xf]  ;;  %v3167_v11 = vor.u32 %v3380_v9, %v3166_v8  ;;  %v3168_v12 = vld [vmem:[#allocation10 + $0x68] sm:$0xf0]  ;;  %v3158_v14 = vld [vmem:[#allocation10 + $0x50] sm:$0xf] }
  0x5d   : > { %892 = vmatpush.bf16.msra.mxu1 %v3175_v3  ;;  %906 = vmatpush.bf16.msra.mxu2 %v3179_v7  ;;  %v3171_v13 = vor.u32 %v3379_v10, %v3168_v12  ;;  %v3378_v15 = vld [vmem:[#allocation10 + $0x54] sm:$0xf0]  ;;  %v3377_v16 = vld [vmem:[#allocation10 + $0x54] sm:$0xf]  ;;  %v3160_v17 = vld [vmem:[#allocation10 + $0x58] sm:$0xf0] }
  0x5e   : > { %777 = vmatpush.bf16.msra.mxu0 %v3365_v6  ;;  %v3364_v18 = vld [vmem:[#allocation7 + $0x28] sm:$0xff]  ;;  %v3159_v19 = vor.u32 %v3378_v15, %v3158_v14  ;;  %v3163_v20 = vor.u32 %v3377_v16, %v3160_v17  ;;  %v3150_v21 = vld [vmem:[#allocation10 + $0x40] sm:$0xf]  ;;  %v3142_v28 = vld [vmem:[#allocation10 + $0x30] sm:$0xf]  ;;  %s3994_s9 = smov 96  }
  0x5f   : > { %v3376_v22 = vld [vmem:[#allocation10 + $0x44] sm:$0xf0]  ;;  %v3375_v23 = vld [vmem:[#allocation10 + $0x44] sm:$0xf]  ;;  %v3152_v24 = vld [vmem:[#allocation10 + $0x48] sm:$0xf0] }
  0x60   : > { %v3363_v25 = vld [vmem:[#allocation7 + $0x20] sm:$0xff]  ;;  %v3151_v26 = vor.u32 %v3376_v22, %v3150_v21  ;;  %v3155_v27 = vor.u32 %v3375_v23, %v3152_v24  ;;  %v3374_v29 = vld [vmem:[#allocation10 + $0x34] sm:$0xf0]  ;;  %v3373_v30 = vld [vmem:[#allocation10 + $0x34] sm:$0xf]  ;;  %vm971_vm0 = vcmask 1047556  }
  0x61   : > { %893 = vmatpush.bf16.msra.mxu1 %v3167_v11  ;;  %907 = vmatpush.bf16.msra.mxu2 %v3171_v13  ;;  %v3144_v31 = vld [vmem:[#allocation10 + $0x38] sm:$0xf0]  ;;  %v3134_v33 = vld [vmem:[#allocation10 + $0x20] sm:$0xf]  ;;  %v3143_v34 = vor.u32 %v3374_v29, %v3142_v28  ;;  %v3372_v35 = vld [vmem:[#allocation10 + $0x24] sm:$0xf0] }
  0x62   : > { %778 = vmatpush.bf16.msra.mxu0 %v3364_v18  ;;  %v3362_v32 = vld [vmem:[#allocation7 + $0x18] sm:$0xff]  ;;  %v3147_v36 = vor.u32 %v3373_v30, %v3144_v31  ;;  %v3371_v37 = vld [vmem:[#allocation10 + $0x24] sm:$0xf]  ;;  %v3136_v38 = vld [vmem:[#allocation10 + $0x28] sm:$0xf0]  ;;  %v3135_v40 = vor.u32 %v3372_v35, %v3134_v33  ;;  %vm1651_vm1 = vcmask 261120  }
  0x63   : > { %v3361_v39 = vld [vmem:[#allocation7 + $0x10] sm:$0xff]  ;;  %v3139_v41 = vor.u32 %v3371_v37, %v3136_v38  ;;  %v3370_v43 = vld [vmem:[#allocation10 + $0x14] sm:$0xf0]  ;;  %v3128_v45 = vld [vmem:[#allocation10 + $0x18] sm:$0xf0]  ;;  %vm1750_vm2 = vcmask 130048  }
  0x64   : > { %v3126_v42 = vld [vmem:[#allocation10 + $0x10] sm:$0xf]  ;;  %v3369_v44 = vld [vmem:[#allocation10 + $0x14] sm:$0xf]  ;;  %v3360_v46 = vld [vmem:[#allocation7 + $0x8] sm:$0xff]  ;;  %vm2198_vm3 = vcmask 523264  }
  0x65   : > { %894 = vmatpush.bf16.msra.mxu1 %v3159_v19  ;;  %908 = vmatpush.bf16.msra.mxu2 %v3163_v20  ;;  %v3127_v47 = vor.u32 %v3370_v43, %v3126_v42  ;;  %v3131_v48 = vor.u32 %v3369_v44, %v3128_v45  ;;  %v3118_v49 = vld [vmem:[#allocation10] sm:$0xf]  ;;  %v3368_v50 = vld [vmem:[#allocation10 + $0x4] sm:$0xf0]  ;;  %v3367_v51 = vld [vmem:[#allocation10 + $0x4] sm:$0xf] }
  0x66   : > { %779 = vmatpush.bf16.msra.mxu0 %v3363_v25  ;;  %v3120_v52 = vld [vmem:[#allocation10 + $0x8] sm:$0xf0]  ;;  %v3359_v53 = vld [vmem:[#allocation7] sm:$0xff]  ;;  %v3119_v56 = vor.u32 %v3368_v50, %v3118_v49  ;;  %v3995_v22 = vmov 1983009808   ;;  %vm2201_vm4 = vcmask 785408  }
  0x67   : > { %v702_v54 = vld [vmem:[%s4241_s30] sm:$0xff]  ;;  %v703_v55 = vld [vmem:[%s4241_s30 + $0x8] sm:$0xff]  ;;  %v3123_v59 = vor.u32 %v3367_v51, %v3120_v52  ;;  %v962_v23 = vunpack.c.l.s4 %v3995_v22  ;;  %s5155_s19 = sld [smem:[#allocation35_spill]]  ;;  %s698_s3 = scalar_lea.vmem [#allocation16], %s4237_s10 }
  0x68   : > { %v705_v57 = vld [vmem:[%s614_s0] sm:$0xff]  ;;  %v706_v58 = vld [vmem:[%s614_s0 + $0x8] sm:$0xff]  ;;  %v704_v60 = vpack.c.bf16 %v703_v55, %v702_v54  ;;  %s5156_s15 = sld [smem:[#allocation37_spill]]  ;;  %s2888_s14 = sshll.u32 %s698_s3, 4  ;;  %s2889_s14 = int_to_ptr.vmem [resolvable:$true] %s2888_s14 }
  0x69   : > { %895 = vmatpush.bf16.msra.mxu1 %v3151_v26  ;;  %909 = vmatpush.bf16.msra.mxu2 %v3155_v27  ;;  %v707_v61 = vpack.c.bf16 %v706_v58, %v705_v57  ;;  %v806_v62 = vld [vmem:[%s5098_s5] sm:$0x3]  ;;  %v3996_v26 = vmov 1934713408   ;;  %v4320_v33 = vunpack.c.0.s8 %v962_v23  ;;  %s5160_s23 = sld [smem:[#allocation25_spill]]  ;;  %s2874_s24 = scalar_lea.sflag [#allocation4], %s4234_s12 }
  0x6a   : > { %780 = vmatpush.bf16.msra.mxu0 %v3362_v32  ;;  %v808_v0 = vperm.slane %v806_v62, 0  ;;  %v809_v2 = vperm.slane %v806_v62, 1  ;;  %v3579_v6 = vld [vmem:[#allocation8] ss:$0 sm:$0xff]  ;;  %v976_v27 = vunpack.c.l.s4 %v3996_v26  ;;  %s5161_s27 = sld [smem:[#allocation40_spill]] }
  0x6b   : > { %s5163_s20 = sld [smem:[#allocation42_spill]] }
  0x6d   : > { %896 = vmatpush.bf16.msra.mxu1 %v3143_v34  ;;  %910 = vmatpush.bf16.msra.mxu2 %v3147_v36 }
  0x6e   : > { %781 = vmatpush.bf16.msra.mxu0 %v3361_v39 }
  0x71   : > { %897 = vmatpush.bf16.msra.mxu1 %v3135_v40  ;;  %911 = vmatpush.bf16.msra.mxu2 %v3139_v41  ;;  %v4328_v40 = vunpack.c.0.s8 %v976_v27  ;;  %s3898_s6 = scalar_lea.hbm %s5163_s20, 32 }
  0x72   : > { %782 = vmatpush.bf16.msra.mxu0 %v3360_v46 }
  0x75   : > { %898 = vmatpush.bf16.msra.mxu1 %v3127_v47  ;;  %912 = vmatpush.bf16.msra.mxu2 %v3131_v48 }
  0x76   : > { %783 = vmatpush.bf16.msra.mxu0 %v3359_v53 }
  0x79   : > { %899 = vmatpush.bf16.msra.mxu1 %v3119_v56  ;;  %913 = vmatpush.bf16.msra.mxu2 %v3123_v59 }
  0x7a   : > { %784 = vmatmul.bf16.vlgmr.msra.gmra.mxu0 %v704_v60 }
  0x7c   : > { %900 = vmatmul.bf16.vlgmr.msra.gmra.mxu1 %v707_v61  ;;  %914 = vmatmul.bf16.vlgmr.msra.gmra.mxu2 %v707_v61 }
  0xf7   : > { %v785_v63 = vpop.f32.mrf.mxu0 }
  0xf8   : > { %v786_v10 = vadd.f32 %v3579_v6, %v785_v63 }
  0xf9   : > { %v901_v1 = vpop.f32.mrf.mxu1 }
  0xfa   : > { %v902_v3 = vadd.f32 %v901_v1, %v808_v0  ;;  %v4286_v15 = vpack.c.bf16 %v786_v10, %v786_v10 }
  0xfc   : > { %v939_v28 = vshrl.u32 %v4286_v15, 16 }
  0xff   : > { %v915_v4 = vpop.f32.mrf.mxu2  ;;  %v787_v8 = vpop.f32.mrf.mxu0 }
 0x100   : > { %v916_v5 = vadd.f32 %v915_v4, %v809_v2  ;;  %v788_v11 = vadd.f32 %v3579_v6, %v787_v8 }
 0x101   : > { %v903_v9 = vpop.f32.mrf.mxu1 }
 0x102   : > { %v4278_v7 = vpack.c.bf16 %v916_v5, %v902_v3  ;;  %v904_v13 = vadd.f32 %v903_v9, %v808_v0  ;;  %v4288_v16 = vpack.c.bf16 %v788_v11, %v788_v11 }
 0x104   : > { %1177 = vrot.lane.b32.xlu2 %v4278_v7, %s3992_s29  ;;  %1173 = vrot.lane.b32.xlu1 %v4278_v7, %s3993_s2  ;;  %v1409_v20 = vrot.slane %v4278_v7, 4  ;;  %v1184_v30 = vshrl.u32 %v4278_v7, 16  ;;  %v951_v32 = vshrl.u32 %v4288_v16, 16 }
 0x105   : > { %1169 = vrot.lane.b32.xlu0 %v4278_v7, %s3994_s9 }
 0x106   : > { %v1420_v31 = vshrl.u32 %v1409_v20, 16 }
 0x107   : > { %v917_v12 = vpop.f32.mrf.mxu2 }
 0x108   : > { %v918_v14 = vadd.f32 %v917_v12, %v809_v2 }
 0x10a   : > { %v4290_v17 = vpack.c.bf16 %v918_v14, %v904_v13 }
 0x10c   : > { %926 = vrot.lane.b32.xlu1 %v4288_v16, %s3994_s9  ;;  %928 = vrot.lane.b32.xlu2 %v4286_v15, %s3993_s2  ;;  %v1410_v24 = vrot.slane %v4290_v17, 4  ;;  %v1196_v34 = vshrl.u32 %v4290_v17, 16 }
 0x10d   : > { %1171 = vrot.lane.b32.xlu0 %v4290_v17, %s3994_s9 }
 0x10e   : > { %v4325_v35 = vshrl.u32 %v1410_v24, 16 }
 0x114   : > { %1175 = vrot.lane.b32.xlu1 %v4290_v17, %s3993_s2  ;;  %1179 = vrot.lane.b32.xlu2 %v4290_v17, %s3992_s29 }
 0x115   : > { %924 = vrot.lane.b32.xlu0 %v4286_v15, %s3994_s9 }
 0x11c   : > { %932 = vrot.lane.b32.xlu1 %v4286_v15, %s3992_s29  ;;  %934 = vrot.lane.b32.xlu2 %v4288_v16, %s3992_s29 }
 0x11d   : > { %930 = vrot.lane.b32.xlu0 %v4288_v16, %s3993_s2 }
 0x15e   : > { %v1178_v18 = vpop.permute.xlu2 %1177 }
 0x15f   : > { %v1415_v25 = vrot.slane %v1178_v18, 4  ;;  %v1191_v36 = vshrl.u32 %v1178_v18, 16 }
 0x161   : > { %v1427_v37 = vshrl.u32 %v1415_v25, 16 }
 0x166   : > { %v4310_v19 = vpop.permute.xlu2 %928 }
 0x167   : > { %v945_v38 = vshrl.u32 %v4310_v19, 16 }
 0x16e   : > { %v4313_v21 = vpop.permute.xlu2 %1179 }
 0x16f   : > { %v1416_v29 = vrot.slane %v4313_v21, 4  ;;  %v1203_v41 = vshrl.u32 %v4313_v21, 16 }
 0x171   : > { %v4333_v46 = vshrl.u32 %v1416_v29, 16 }
 0x176   : > { %v1174_v39 = vpop.permute.xlu1 %1173 }
 0x177   : > { %v1189_v42 = vpack.i.b16 %v1178_v18, %v1174_v39  ;;  %v1190_v43 = vshrl.u32 %v1174_v39, 16  ;;  %v1413_v44 = vrot.slane %v1174_v39, 4  ;;  %v1170_v45 = vpop.permute.xlu0 %1169  ;;  %v4351_v18 = vpop.permute.xlu2 %934 }
 0x178   : > { %v1183_v47 = vpack.i.b16 %v1170_v45, %v4278_v7  ;;  %v1185_v48 = vshrl.u32 %v1170_v45, 16  ;;  %v1411_v49 = vrot.slane %v1170_v45, 4 }
 0x179   : > { %v1192_v50 = vpack.i.b16 %v1191_v36, %v1190_v43  ;;  %v1214_v51 = vperm.slane %v1189_v42, %v4320_v33  ;;  %v1425_v52 = vpack.i.b16 %v1415_v25, %v1413_v44  ;;  %v1426_v53 = vshrl.u32 %v1413_v44, 16 }
 0x17a   : > { %v1186_v54 = vpack.i.b16 %v1185_v48, %v1184_v30  ;;  %v1209_v55 = vperm.slane %v1183_v47, %v4320_v33  ;;  %v1419_v56 = vpack.i.b16 %v1411_v49, %v1409_v20  ;;  %v1421_v57 = vshrl.u32 %v1411_v49, 16 }
 0x17b   : > { %v1215_v58 = vrot.slane %v1214_v51, 4  ;;  %v1240_v59 = vperm.slane %v1192_v50, %v4320_v33  ;;  %v1428_v60 = vpack.i.b16 %v1427_v37, %v1426_v53  ;;  %v1450_v61 = vperm.slane %v1425_v52, %v4320_v33 }
 0x17c   : > { %v1217_v62 = vrot.slane %v1209_v55, 4  ;;  %v1235_v63 = vperm.slane %v1186_v54, %v4320_v33  ;;  %v1422_v0 = vpack.i.b16 %v1421_v57, %v1420_v31  ;;  %v1445_v1 = vperm.slane %v1419_v56, %v4320_v33 }
 0x17d   : > { %v1241_v2 = vrot.slane %v1240_v59, 4  ;;  %v1451_v3 = vrot.slane %v1450_v61, 4  ;;  %v1476_v4 = vperm.slane %v1428_v60, %v4320_v33  ;;  %v1216_v5 = vsel %vm971_vm0, %v1215_v58, %v1209_v55 }
 0x17e   : > { %v1218_v6 = vsel %vm971_vm0, %v1214_v51, %v1217_v62  ;;  %v4346_v7 = vperm.slane %v1216_v5, %v4328_v40  ;;  %v1243_v8 = vrot.slane %v1235_v63, 4  ;;  %v1453_v9 = vrot.slane %v1445_v1, 4  ;;  %v927_v10 = vpop.permute.xlu1 %926 }
 0x17f   : > { %v1477_v11 = vrot.slane %v1476_v4, 4  ;;  %v1226_v12 = vperm.slane %v1218_v6, %v4328_v40  ;;  %v1242_v13 = vsel %vm971_vm0, %v1241_v2, %v1235_v63  ;;  %v1452_v14 = vsel %vm971_vm0, %v1451_v3, %v1445_v1  ;;  %v1172_v20 = vpop.permute.xlu0 %1171 }
 0x180   : > { %v1227_v22 = vrot.slane %v4346_v7, 4  ;;  %v1244_v23 = vsel %vm971_vm0, %v1240_v59, %v1243_v8  ;;  %v4356_v25 = vperm.slane %v1242_v13, %v4328_v40  ;;  %v1454_v26 = vsel %vm971_vm0, %v1450_v61, %v1453_v9 }
 0x181   : > { %v4359_v27 = vrot.slane %v1226_v12, 4  ;;  %v1252_v30 = vperm.slane %v1244_v23, %v4328_v40  ;;  %v4363_v31 = vperm.slane %v1452_v14, %v4328_v40  ;;  %v1462_v36 = vperm.slane %v1454_v26, %v4328_v40 }
 0x182   : > { %v1253_v37 = vrot.slane %v4356_v25, 4  ;;  %v1471_v39 = vperm.slane %v1422_v0, %v4320_v33  ;;  %v958_v42 = vshrl.u32 %v4351_v18, 16  ;;  %v1195_v43 = vpack.i.b16 %v1172_v20, %v4290_v17 }
 0x183   : > { %v4372_v44 = vsel %vm971_vm0, 0, %v4359_v27  ;;  %v4374_v45 = vrot.slane %v1252_v30, 4  ;;  %v1463_v47 = vrot.slane %v4363_v31, 4  ;;  %v4377_v48 = vrot.slane %v1462_v36, 4 }
 0x184   : > { %v4380_v49 = vsel %vm971_vm0, 0, %v1227_v22  ;;  %v4383_v50 = vsel %vm971_vm0, 0, %v1253_v37  ;;  %v1478_v51 = vsel %vm971_vm0, %v1477_v11, %v1471_v39  ;;  %v1479_v52 = vrot.slane %v1471_v39, 4 }
 0x185   : > { %v4388_v53 = vsel %vm971_vm0, 0, %v4374_v45  ;;  %v1314_v54 = vrot.slane %v4372_v44, 4  ;;  %v4393_v55 = vsel %vm971_vm0, 0, %v4377_v48  ;;  %v4396_v56 = vperm.slane %v1478_v51, %v4328_v40 }
 0x186   : > { %v1333_v57 = vrot.slane %v4388_v53, 4  ;;  %v4400_v58 = vsel %vm971_vm0, 0, %v1463_v47  ;;  %v1480_v59 = vsel %vm971_vm0, %v1476_v4, %v1479_v52  ;;  %v1197_v60 = vshrl.u32 %v1172_v20, 16  ;;  %v1176_v61 = vpop.permute.xlu1 %1175 }
 0x187   : > { %v1488_v62 = vperm.slane %v1480_v59, %v4328_v40  ;;  %v1550_v63 = vrot.slane %v4393_v55, 4  ;;  %v1261_v0 = vperm.slane %v1195_v43, %v4320_v33  ;;  %v1412_v1 = vrot.slane %v1172_v20, 4 }
 0x188   : > { %v1198_v2 = vpack.i.b16 %v1197_v60, %v1196_v34  ;;  %v950_v3 = vpack.i.b16 %v927_v10, %v4288_v16  ;;  %v952_v5 = vshrl.u32 %v927_v10, 16  ;;  %v1201_v6 = vpack.i.b16 %v4313_v21, %v1176_v61 }
 0x189   : > { %v1489_v8 = vrot.slane %v4396_v56, 4  ;;  %v4411_v4 = vrot.slane %v1488_v62, 4  ;;  %v1431_v9 = vpack.i.b16 %v1412_v1, %v1410_v24  ;;  %v1433_v11 = vshrl.u32 %v1412_v1, 16  ;;  %v925_v24 = vpop.permute.xlu0 %924 }
 0x18a   : > { %v1287_v12 = vperm.slane %v1198_v2, %v4320_v33  ;;  %v953_v13 = vpack.i.b16 %v952_v5, %v951_v32  ;;  %v4419_v34 = vperm.slane %v950_v3, %v4320_v33  ;;  %v1202_v14 = vshrl.u32 %v1176_v61, 16 }
 0x18b   : > { %v4423_v10 = vsel %vm971_vm0, 0, %v4411_v4  ;;  %v1434_v20 = vpack.i.b16 %v1433_v11, %v4325_v35  ;;  %v1497_v22 = vperm.slane %v1431_v9, %v4320_v33  ;;  %v1266_v17 = vperm.slane %v1201_v6, %v4320_v33 }
 0x18c   : > { %v1569_v23 = vrot.slane %v4423_v10, 4  ;;  %v1269_v26 = vrot.slane %v1261_v0, 4  ;;  %v1295_v16 = vrot.slane %v1287_v12, 4  ;;  %v4430_v32 = vperm.slane %v953_v13, %v4320_v33 }
 0x18d   : > { %v1505_v30 = vrot.slane %v1497_v22, 4  ;;  %v1025_v36 = vrot.slane %v4419_v34, 4  ;;  %v1204_v37 = vpack.i.b16 %v1203_v41, %v1202_v14  ;;  %v1267_v39 = vrot.slane %v1266_v17, 4 }
 0x18e   : > { %v1523_v35 = vperm.slane %v1434_v20, %v4320_v33  ;;  %v1270_v43 = vsel %vm971_vm0, %v1266_v17, %v1269_v26  ;;  %v1414_v47 = vrot.slane %v1176_v61, 4  ;;  %v938_v51 = vpack.i.b16 %v925_v24, %v4286_v15 }
 0x18f   : > { %v1051_v52 = vrot.slane %v4430_v32, 4  ;;  %v1268_v59 = vsel %vm971_vm0, %v1267_v39, %v1261_v0  ;;  %v1278_v60 = vperm.slane %v1270_v43, %v4328_v40  ;;  %v1292_v62 = vperm.slane %v1204_v37, %v4320_v33 }
 0x190   : > { %v4443_v1 = vperm.slane %v1268_v59, %v4328_v40  ;;  %v1437_v41 = vpack.i.b16 %v1416_v29, %v1414_v47  ;;  %v1438_v2 = vshrl.u32 %v1414_v47, 16  ;;  %v940_v3 = vshrl.u32 %v925_v24, 16  ;;  %v933_v24 = vpop.permute.xlu1 %932 }
 0x191   : > { %v4447_v5 = vrot.slane %v1278_v60, 4  ;;  %v1293_v61 = vrot.slane %v1292_v62, 4  ;;  %v1296_v6 = vsel %vm971_vm0, %v1292_v62, %v1295_v16  ;;  %v964_v9 = vperm.slane %v938_v51, %v4320_v33  ;;  %v931_v60 = vpop.permute.xlu0 %930 }
 0x192   : > { %v1279_v0 = vrot.slane %v4443_v1, 4  ;;  %v1304_v11 = vperm.slane %v1296_v6, %v4328_v40  ;;  %v1440_v13 = vpack.i.b16 %v4333_v46, %v1438_v2  ;;  %v1502_v14 = vperm.slane %v1437_v41, %v4320_v33 }
 0x193   : > { %v1531_v20 = vrot.slane %v1523_v35, 4  ;;  %v4457_v21 = vsel %vm971_vm0, 0, %v4447_v5  ;;  %v1294_v29 = vsel %vm971_vm0, %v1293_v61, %v1287_v12  ;;  %v941_v17 = vpack.i.b16 %v940_v3, %v939_v28 }
 0x194   : > { %v4463_v26 = vsel %vm971_vm0, 0, %v1279_v0  ;;  %v4466_v16 = vperm.slane %v1294_v29, %v4328_v40  ;;  %v4468_v46 = vrot.slane %v1304_v11, 4  ;;  %v973_v37 = vrot.slane %v964_v9, 4 }
 0x195   : > { %v1352_v39 = vrot.slane %v4457_v21, 4  ;;  %v1503_v43 = vrot.slane %v1502_v14, 4  ;;  %v1506_v47 = vsel %vm971_vm0, %v1502_v14, %v1505_v30  ;;  %v1528_v12 = vperm.slane %v1440_v13, %v4320_v33 }
 0x196   : > { %v4475_v15 = vsel %vm971_vm0, 0, %v4468_v46  ;;  %v1514_v28 = vperm.slane %v1506_v47, %v4328_v40  ;;  %v991_v51 = vperm.slane %v941_v17, %v4320_v33  ;;  %v944_v59 = vpack.i.b16 %v933_v24, %v4310_v19 }
 0x197   : > { %v1305_v62 = vrot.slane %v4466_v16, 4  ;;  %v1504_v41 = vsel %vm971_vm0, %v1503_v43, %v1497_v22  ;;  %v1529_v2 = vrot.slane %v1528_v12, 4  ;;  %v1532_v30 = vsel %vm971_vm0, %v1528_v12, %v1531_v20 }
 0x198   : > { %v1371_v3 = vrot.slane %v4475_v15, 4  ;;  %v4485_v61 = vperm.slane %v1504_v41, %v4328_v40  ;;  %v4487_v6 = vrot.slane %v1514_v28, 4  ;;  %v1540_v0 = vperm.slane %v1532_v30, %v4328_v40 }
 0x199   : > { %v1530_v11 = vsel %vm971_vm0, %v1529_v2, %v1523_v35  ;;  %v946_v13 = vshrl.u32 %v933_v24, 16  ;;  %v969_v14 = vperm.slane %v944_v59, %v4320_v33  ;;  %v956_v29 = vpack.i.b16 %v4351_v18, %v931_v60 }
 0x19a   : > { %v4495_v22 = vsel %vm971_vm0, 0, %v4487_v6  ;;  %v4498_v20 = vperm.slane %v1530_v11, %v4328_v40  ;;  %v4500_v17 = vrot.slane %v1540_v0, 4  ;;  %v999_v43 = vrot.slane %v991_v51, 4 }
 0x19b   : > { %v1515_v47 = vrot.slane %v4485_v61, 4  ;;  %v947_v35 = vpack.i.b16 %v946_v13, %v945_v38  ;;  %v970_v24 = vrot.slane %v969_v14, 4  ;;  %v974_v12 = vsel %vm971_vm0, %v969_v14, %v973_v37 }
 0x19c   : > { %v4508_v28 = vsel %vm971_vm0, 0, %v4500_v17  ;;  %v982_v41 = vperm.slane %v974_v12, %v4328_v40  ;;  %v957_v2 = vshrl.u32 %v931_v60, 16  ;;  %v1541_v30 = vrot.slane %v4498_v20, 4 }
 0x19d   : > { %v972_v0 = vsel %vm971_vm0, %v970_v24, %v964_v9  ;;  %v996_v11 = vperm.slane %v947_v35, %v4320_v33  ;;  %v1022_v19 = vperm.slane %v956_v29, %v4320_v33  ;;  %v1334_v44 = vsel %vm971_vm0, %v1333_v57, %v4383_v50 }
 0x19e   : > { %v978_v37 = vperm.slane %v972_v0, %v4328_v40  ;;  %v985_v13 = vrot.slane %v982_v41, 4  ;;  %v959_v14 = vpack.i.b16 %v958_v42, %v957_v2  ;;  %v1338_v53 = vperm.slane %v1334_v44, %v4320_v33 }
 0x19f   : > { %v997_v59 = vrot.slane %v996_v11, 4  ;;  %v1000_v12 = vsel %vm971_vm0, %v996_v11, %v999_v43  ;;  %v1023_v60 = vrot.slane %v1022_v19, 4  ;;  %v1026_v9 = vsel %vm971_vm0, %v1022_v19, %v1025_v36 }
 0x1a0   : > { %v983_v24 = vrot.slane %v978_v37, 4  ;;  %v986_v35 = vsel %vm971_vm0, 0, %v985_v13  ;;  %v1008_v29 = vperm.slane %v1000_v12, %v4328_v40  ;;  %v4527_v38 = vsel %vm971_vm0, %v985_v13, %v978_v37 }
 0x1a1   : > { %v998_v41 = vsel %vm971_vm0, %v997_v59, %v991_v51  ;;  %v1070_v18 = vrot.slane %v986_v35, 4  ;;  %v1024_v42 = vsel %vm971_vm0, %v1023_v60, %v4419_v34  ;;  %v1306_v43 = vsel %vm971_vm0, 0, %v1305_v62 }
 0x1a2   : > { %v984_v2 = vsel %vm971_vm0, 0, %v983_v24  ;;  %v1004_v36 = vperm.slane %v998_v41, %v4328_v40  ;;  %v1011_v0 = vrot.slane %v1008_v29, 4  ;;  %v1030_v11 = vperm.slane %v1024_v42, %v4328_v40 }
 0x1a3   : > { %v1069_v19 = vperm.slane %v4527_v38, %v4320_v33  ;;  %v4539_v37 = vsel %vm971_vm0, %v1070_v18, %v984_v2  ;;  %v1034_v51 = vperm.slane %v1026_v9, %v4328_v40  ;;  %v1048_v59 = vperm.slane %v959_v14, %v4320_v33 }
 0x1a4   : > { %v1009_v34 = vrot.slane %v1004_v36, 4  ;;  %v4544_v62 = vsel %vm971_vm0, 0, %v1011_v0  ;;  %v1035_v13 = vrot.slane %v1030_v11, 4  ;;  %v1309_v12 = vsel %vm971_vm0, %v4359_v27, %v4346_v7 }
 0x1a5   : > { %v4550_v60 = vsel %vm971_vm0, %v1011_v0, %v1004_v36  ;;  %v1037_v24 = vrot.slane %v1034_v51, 4  ;;  %v1049_v35 = vrot.slane %v1048_v59, 4  ;;  %v1052_v9 = vsel %vm971_vm0, %v1048_v59, %v1051_v52 }
 0x1a6   : > { %v4556_v14 = vsel %vm971_vm0, 0, %v1009_v34  ;;  %v1089_v29 = vrot.slane %v4544_v62, 4  ;;  %v1036_v41 = vsel %vm971_vm0, 0, %v1035_v13  ;;  %v1060_v18 = vperm.slane %v1052_v9, %v4328_v40 }
 0x1a7   : > { %v1038_v7 = vsel %vm971_vm0, 0, %v1037_v24  ;;  %v1050_v27 = vsel %vm971_vm0, %v1049_v35, %v4430_v32  ;;  %v4565_v42 = vsel %vm971_vm0, %v1037_v24, %v1030_v11  ;;  %v1315_v52 = vsel %vm971_vm0, %v1314_v54, %v4380_v49 }
 0x1a8   : > { %v1056_v2 = vperm.slane %v1050_v27, %v4328_v40  ;;  %v1063_v36 = vrot.slane %v1060_v18, 4  ;;  %v1108_v0 = vrot.slane %v1038_v7, 4  ;;  %v1313_v51 = vperm.slane %v1309_v12, %v4320_v33 }
 0x1a9   : > { %v1107_v59 = vperm.slane %v4565_v42, %v4320_v33  ;;  %v1319_v34 = vperm.slane %v1315_v52, %v4320_v33  ;;  %v1328_v32 = vsel %vm971_vm0, %v4374_v45, %v4356_v25  ;;  %v1347_v13 = vsel %vm971_vm0, %v4447_v5, %v4443_v1 }
 0x1aa   : > { %v1061_v49 = vrot.slane %v1056_v2, 4  ;;  %v4584_v54 = vsel %vm971_vm0, 0, %v1063_v36  ;;  %v4587_v11 = vsel %vm971_vm0, %v1108_v0, %v1036_v41  ;;  %v4593_v12 = vsel %vm971_vm0, %v1063_v36, %v1056_v2 }
 0x1ab   : > { %v1127_v25 = vrot.slane %v4584_v54, 4  ;;  %v1320_v45 = vrot.slane %v1319_v34, 4  ;;  %v1332_v57 = vperm.slane %v1328_v32, %v4320_v33  ;;  %v1353_v24 = vsel %vm971_vm0, %v1352_v39, %v4463_v26 }
 0x1ac   : > { %v4598_v50 = vsel %vm971_vm0, 0, %v1061_v49  ;;  %v1366_v1 = vsel %vm971_vm0, %v4468_v46, %v4466_v16  ;;  %v1339_v35 = vrot.slane %v1338_v53, 4  ;;  %v1351_v9 = vperm.slane %v1347_v13, %v4320_v33 }
 0x1ad   : > { %v1321_v5 = vsel %vm971_vm0, %v1320_v45, %v1313_v51  ;;  %v1357_v41 = vperm.slane %v1353_v24, %v4320_v33  ;;  %v1370_v7 = vperm.slane %v1366_v1, %v4320_v33  ;;  %v1372_v21 = vsel %vm971_vm0, %v1371_v3, %v1306_v43 }
 0x1ae   : > { %v4612_v18 = vperm.slane %v1321_v5, %v4328_v40  ;;  %v1490_v26 = vsel %vm971_vm0, 0, %v1489_v8  ;;  %v1340_v16 = vsel %vm971_vm0, %v1339_v35, %v1332_v57  ;;  %v1376_v39 = vperm.slane %v1372_v21, %v4320_v33 }
 0x1af   : > { %v1358_v46 = vrot.slane %v1357_v41, 4  ;;  %v1516_v27 = vsel %vm971_vm0, 0, %v1515_v47  ;;  %v4627_v52 = vperm.slane %v1340_v16, %v4328_v40  ;;  %v1542_v15 = vsel %vm971_vm0, 0, %v1541_v30 }
 0x1b0   : > { %v1545_v8 = vsel %vm971_vm0, %v4377_v48, %v4363_v31  ;;  %v1551_v3 = vsel %vm971_vm0, %v1550_v63, %v4400_v58  ;;  %v1377_v2 = vrot.slane %v1376_v39, 4  ;;  %v1564_v31 = vsel %vm971_vm0, %v4411_v4, %v4396_v56 }
 0x1b1   : > { %v1359_v43 = vsel %vm971_vm0, %v1358_v46, %v1351_v9  ;;  %v1549_v47 = vperm.slane %v1545_v8, %v4320_v33  ;;  %v1555_v36 = vperm.slane %v1551_v3, %v4320_v33  ;;  %v1387_v30 = vpack.i.b16 %v4627_v52, %v4612_v18 }
 0x1b2   : > { %v4643_v0 = vperm.slane %v1359_v43, %v4328_v40  ;;  %v1570_v48 = vsel %vm971_vm0, %v1569_v23, %v1490_v26  ;;  %v1378_v55 = vsel %vm971_vm0, %v1377_v2, %v1370_v7  ;;  %v1568_v63 = vperm.slane %v1564_v31, %v4320_v33 }
 0x1b3   : > { %v1556_v58 = vrot.slane %v1555_v36, 4  ;;  %v1574_v51 = vperm.slane %v1570_v48, %v4320_v33  ;;  %v1382_v34 = vperm.slane %v1378_v55, %v4328_v40  ;;  %v1648_v32 = vunpack.c.l.b16 %v1387_v30 }
 0x1b4   : > { %v1583_v44 = vsel %vm971_vm0, %v4487_v6, %v4485_v61  ;;  %v5153_v56 = vrot.slane %v4495_v22, 4  ;;  %v1602_v57 = vsel %vm971_vm0, %v4500_v17, %v4498_v20  ;;  %v5154_v61 = vrot.slane %v4508_v28, 4 }
 0x1b5   : > { %v1557_v10 = vsel %vm971_vm0, %v1556_v58, %v1549_v47  ;;  %v1575_v23 = vrot.slane %v1574_v51, 4  ;;  %v1587_v49 = vperm.slane %v1583_v44, %v4320_v33  ;;  %v1399_v45 = vpack.i.b16 %v1382_v34, %v4643_v0 }
 0x1b6   : > { %v1589_v4 = vsel %vm971_vm0, %v5153_v56, %v1516_v27  ;;  %v1561_v53 = vperm.slane %v1557_v10, %v4328_v40  ;;  %v1608_v6 = vsel %vm971_vm0, %v5154_v61, %v1542_v15  ;;  %v1606_v1 = vperm.slane %v1602_v57, %v4320_v33 }
 0x1b7   : > { %v1593_v13 = vperm.slane %v1589_v4, %v4320_v33  ;;  %v1576_v22 = vsel %vm971_vm0, %v1575_v23, %v1568_v63  ;;  %v1612_v5 = vperm.slane %v1608_v6, %v4320_v33  ;;  %v1649_v35 = vunpack.c.l.b16 %v1399_v45 }
 0x1b8   : > { %v1562_v9 = vrot.slane %v1561_v53, 4  ;;  %v1580_v41 = vperm.slane %v1576_v22, %v4328_v40  ;;  %v1388_v7 = vshrl.u32 %v4612_v18, 16  ;;  %v1389_v17 = vshrl.u32 %v4627_v52, 16 }
 0x1b9   : > { %v1594_v24 = vrot.slane %v1593_v13, 4  ;;  %v1613_v20 = vrot.slane %v1612_v5, 4  ;;  %v1400_v28 = vshrl.u32 %v4643_v0, 16  ;;  %v1650_v26 = vpack.c.b16 %v1649_v35, %v1648_v32 }
 0x1ba   : > { %v1581_v16 = vrot.slane %v1580_v41, 4  ;;  %v1623_v39 = vpack.i.b16 %v1580_v41, %v1561_v53  ;;  %v1390_v15 = vpack.i.b16 %v1389_v17, %v1388_v7  ;;  %v1401_v8 = vshrl.u32 %v1382_v34, 16 }
 0x1bb   : > { %v1595_v21 = vsel %vm971_vm0, %v1594_v24, %v1587_v49  ;;  %v1614_v27 = vsel %vm971_vm0, %v1613_v20, %v1606_v1  ;;  %v1624_v3 = vshrl.u32 %v1561_v53, 16  ;;  %v1656_v43 = vsel %vm1651_vm1, %v1650_v26, 0 }
 0x1bc   : > { %v1599_v46 = vperm.slane %v1595_v21, %v4328_v40  ;;  %v1618_v47 = vperm.slane %v1614_v27, %v4328_v40  ;;  %v1852_v36 = vunpack.c.l.b16 %v1623_v39  ;;  %1665 = vmatpush.bf16.xpose.msra.mxu3 %v1656_v43  ;;  %v1402_v30 = vpack.i.b16 %v1401_v8, %v1400_v28 }
 0x1bd   : > { %v1675_v31 = vunpack.c.l.b16 %v1390_v15  ;;  %v1625_v48 = vshrl.u32 %v1580_v41, 16  ;;  %v1326_v32 = vrot.slane %v4612_v18, 4  ;;  %v1345_v4 = vrot.slane %v4627_v52, 4 }
 0x1be   : > { %v1600_v2 = vrot.slane %v1599_v46, 4  ;;  %v1636_v55 = vshrl.u32 %v1599_v46, 16  ;;  %v1619_v58 = vrot.slane %v1618_v47, 4  ;;  %v1635_v63 = vpack.i.b16 %v1618_v47, %v1599_v46 }
 0x1bf   : > { %v1637_v51 = vshrl.u32 %v1618_v47, 16  ;;  %v1676_v44 = vunpack.c.l.b16 %v1402_v30  ;;  %v1626_v56 = vpack.i.b16 %v1625_v48, %v1624_v3  ;;  %v1364_v10 = vrot.slane %v4643_v0, 4 }
 0x1c0   : > { %v1853_v23 = vunpack.c.l.b16 %v1635_v63  ;;  %v4690_v13 = vsel %vm971_vm0, 0, %v1326_v32  ;;  %v1383_v45 = vrot.slane %v1382_v34, 4  ;;  %v4693_v61 = vsel %vm971_vm0, 0, %v1345_v4 }
 0x1c1   : > { %v1638_v49 = vpack.i.b16 %v1637_v51, %v1636_v55  ;;  %v1677_v53 = vpack.c.b16 %v1676_v44, %v1675_v31  ;;  %v1878_v57 = vunpack.c.l.b16 %v1626_v56  ;;  %v1365_v6 = vsel %vm971_vm0, 0, %v1364_v10 }
 0x1c2   : > { %v1854_v18 = vpack.c.b16 %v1853_v23, %v1852_v36  ;;  %v1384_v24 = vsel %vm971_vm0, 0, %v1383_v45  ;;  %v1394_v52 = vshrl.u32 %v4690_v13, 16  ;;  %v1395_v1 = vshrl.u32 %v4693_v61, 16 }
 0x1c3   : > { %v1879_v22 = vunpack.c.l.b16 %v1638_v49  ;;  %v1682_v0 = vsel %vm1651_vm1, %v1677_v53, 0  ;;  %v1406_v5 = vshrl.u32 %v1365_v6, 16  ;;  %v1407_v35 = vshrl.u32 %v1384_v24, 16 }
 0x1c4   : > { %1866 = vmatpush.bf16.msrb.mxu2 %v1854_v18  ;;  %1691 = vmatpush.bf16.xpose.msrb.mxu3 %v1682_v0  ;;  %v4701_v41 = vsel %vm971_vm0, 0, %v1562_v9  ;;  %v4704_v7 = vsel %vm971_vm0, 0, %v1581_v16  ;;  %v4707_v21 = vsel %vm971_vm0, 0, %v1600_v2  ;;  %v1396_v20 = vpack.i.b16 %v1395_v1, %v1394_v52 }
 0x1c5   : > { %v1880_v34 = vpack.c.b16 %v1879_v22, %v1878_v57  ;;  %v1408_v17 = vpack.i.b16 %v1407_v35, %v1406_v5  ;;  %v4710_v28 = vsel %vm971_vm0, 0, %v1619_v58  ;;  %v1630_v26 = vshrl.u32 %v4701_v41, 16 }
 0x1c6   : > { %v1631_v46 = vshrl.u32 %v4704_v7, 16  ;;  %v1642_v39 = vshrl.u32 %v4707_v21, 16  ;;  %v1643_v9 = vshrl.u32 %v4710_v28, 16  ;;  %v1075_v16 = vperm.slane %v4539_v37, %v4320_v33 }
 0x1c7   : > { %v1727_v27 = vunpack.c.l.b16 %v1396_v20  ;;  %v1728_v15 = vunpack.c.l.b16 %v1408_v17  ;;  %v1088_v8 = vperm.slane %v4550_v60, %v4320_v33  ;;  %v1090_v3 = vsel %vm971_vm0, %v1089_v29, %v4556_v14 }
 0x1c8   : > { %1892 = vmatpush.bf16.msra.mxu2 %v1880_v34  ;;  %v1632_v43 = vpack.i.b16 %v1631_v46, %v1630_v26  ;;  %v1644_v2 = vpack.i.b16 %v1643_v9, %v1642_v39  ;;  %v1076_v47 = vrot.slane %v1075_v16, 4  ;;  %v1094_v36 = vperm.slane %v1090_v3, %v4320_v33 }
 0x1c9   : > { %v1729_v30 = vpack.c.b16 %v1728_v15, %v1727_v27  ;;  %v1113_v31 = vperm.slane %v4587_v11, %v4320_v33  ;;  %v1126_v37 = vperm.slane %v4593_v12, %v4320_v33  ;;  %v1128_v60 = vsel %vm971_vm0, %v1127_v25, %v4598_v50 }
 0x1ca   : > { %v1930_v62 = vunpack.c.l.b16 %v1632_v43  ;;  %v1931_v48 = vunpack.c.l.b16 %v1644_v2  ;;  %v1077_v14 = vsel %vm971_vm0, %v1076_v47, %v1069_v19  ;;  %v1095_v29 = vrot.slane %v1094_v36, 4 }
 0x1cb   : > { %v1734_v55 = vsel %vm1651_vm1, %v1729_v30, 0  ;;  %v1081_v11 = vperm.slane %v1077_v14, %v4328_v40  ;;  %v1114_v58 = vrot.slane %v1113_v31, 4  ;;  %v1132_v12 = vperm.slane %v1128_v60, %v4320_v33 }
 0x1cc   : > { %1743 = vmatpush.bf16.xpose.msrb.mxu0 %v1734_v55  ;;  %v1932_v63 = vpack.c.b16 %v1931_v48, %v1930_v62  ;;  %v1096_v54 = vsel %vm971_vm0, %v1095_v29, %v1088_v8  ;;  %v1393_v25 = vpack.i.b16 %v4693_v61, %v4690_v13  ;;  %v1405_v50 = vpack.i.b16 %v1384_v24, %v1365_v6 }
 0x1cd   : > { %v1100_v38 = vperm.slane %v1096_v54, %v4328_v40  ;;  %v1115_v19 = vsel %vm971_vm0, %v1114_v58, %v1107_v59  ;;  %v1133_v51 = vrot.slane %v1132_v12, 4  ;;  %v1082_v32 = vrot.slane %v1081_v11, 4 }
 0x1ce   : > { %v1119_v44 = vperm.slane %v1115_v19, %v4328_v40  ;;  %v1702_v49 = vunpack.c.l.b16 %v1405_v50  ;;  %v1701_v53 = vunpack.c.l.b16 %v1393_v25  ;;  %v1144_v27 = vshrl.u32 %v1081_v11, 16 }
 0x1cf   : > { %v1134_v56 = vsel %vm971_vm0, %v1133_v51, %v1126_v37  ;;  %v1143_v4 = vpack.i.b16 %v1100_v38, %v1081_v11  ;;  %v1101_v10 = vrot.slane %v1100_v38, 4  ;;  %v1083_v13 = vsel %vm971_vm0, 0, %v1082_v32 }
 0x1d0   : > { %v1138_v23 = vperm.slane %v1134_v56, %v4328_v40  ;;  %v1120_v45 = vrot.slane %v1119_v44, 4  ;;  %v1150_v18 = vshrl.u32 %v1083_v13, 16  ;;  %v1703_v52 = vpack.c.b16 %v1702_v49, %v1701_v53 }
 0x1d1   : > { %v1102_v42 = vsel %vm971_vm0, 0, %v1101_v10  ;;  %v1645_v59 = vunpack.c.l.b16 %v1143_v4  ;;  %v1145_v39 = vshrl.u32 %v1100_v38, 16  ;;  %v1156_v15 = vshrl.u32 %v1119_v44, 16 }
 0x1d2   : > { %v1155_v57 = vpack.i.b16 %v1138_v23, %v1119_v44  ;;  %v1121_v61 = vsel %vm971_vm0, 0, %v1120_v45  ;;  %v1139_v6 = vrot.slane %v1138_v23, 4  ;;  %v1151_v22 = vshrl.u32 %v1102_v42, 16 }
 0x1d3   : > { %v1162_v5 = vshrl.u32 %v1121_v61, 16  ;;  %v1708_v26 = vsel %vm1651_vm1, %v1703_v52, 0  ;;  %v1157_v9 = vshrl.u32 %v1138_v23, 16  ;;  %v1146_v8 = vpack.i.b16 %v1145_v39, %v1144_v27 }
 0x1d4   : > { %1944 = vmatpush.bf16.msra.mxu0 %v1932_v63  ;;  %v1646_v24 = vunpack.c.l.b16 %v1155_v57  ;;  %v1140_v0 = vsel %vm971_vm0, 0, %v1139_v6  ;;  %v1152_v1 = vpack.i.b16 %v1151_v22, %v1150_v18  ;;  %v1641_v43 = vpack.i.b16 %v4710_v28, %v4707_v21 }
 0x1d5   : > { %v1163_v35 = vshrl.u32 %v1140_v0, 16  ;;  %v1158_v3 = vpack.i.b16 %v1157_v9, %v1156_v15  ;;  %v1629_v2 = vpack.i.b16 %v4704_v7, %v4701_v41  ;;  %v1672_v47 = vunpack.c.l.b16 %v1146_v8 }
 0x1d6   : > { %v1647_v34 = vpack.c.b16 %v1646_v24, %v1645_v59  ;;  %v1724_v17 = vunpack.c.l.b16 %v1152_v1  ;;  %v1905_v30 = vunpack.c.l.b16 %v1641_v43  ;;  %v1149_v62 = vpack.i.b16 %v1102_v42, %v1083_v13 }
 0x1d7   : > { %v1164_v20 = vpack.i.b16 %v1163_v35, %v1162_v5  ;;  %v1673_v36 = vunpack.c.l.b16 %v1158_v3  ;;  %v1904_v31 = vunpack.c.l.b16 %v1629_v2  ;;  %v1161_v48 = vpack.i.b16 %v1140_v0, %v1121_v61 }
 0x1d8   : > { %3180 = vmatmul.msk.bf16.vlgmr.msra.gmra.mxu3 %vm1651_vm1, %v1647_v34  ;;  %v1698_v14 = vunpack.c.l.b16 %v1149_v62 }
 0x1d9   : > { %1717 = vmatpush.bf16.xpose.msra.mxu3 %v1708_v26  ;;  %v1725_v46 = vunpack.c.l.b16 %v1164_v20  ;;  %v1674_v37 = vpack.c.b16 %v1673_v36, %v1672_v47  ;;  %v1906_v60 = vpack.c.b16 %v1905_v30, %v1904_v31  ;;  %v1699_v29 = vunpack.c.l.b16 %v1161_v48 }
 0x1db   : > { %v1726_v16 = vpack.c.b16 %v1725_v46, %v1724_v17  ;;  %v1700_v55 = vpack.c.b16 %v1699_v29, %v1698_v14 }
 0x1dd   : > { %3183 = vmatmul.msk.bf16.vlgmr.msrb.gmra.mxu0 %vm1651_vm1, %v1726_v16 }
 0x1e8   : > { %3181 = vmatmul.msk.bf16.vlgmr.msrb.gmra.mxu3 %vm1651_vm1, %v1674_v37 }
 0x1e9   : > { %1918 = vmatpush.bf16.msrb.mxu3 %v1906_v60 }
 0x1f8   : > { %3182 = vmatmul.msk.bf16.vlgmr.msra.gmra.mxu3 %vm1651_vm1, %v1700_v55 }
 0x25a   : > { %v4766_v11 = vpop.f32.mrf.mxu0 }
 0x25b   : > { %v1667_v21 = vpop.f32.mrf.mxu3  ;;  %v1769_v44 = vsel %vm1750_vm2, %v4766_v11, -inf }
 0x25c   : > { %v1751_v41 = vsel %vm1750_vm2, %v1667_v21, -inf }
 0x25d   : > { %1752 = vmax.xlane.f32.xlu0 %v1751_v41 }
 0x262   : > { %v1747_v63 = vpop.f32.mrf.mxu0 }
 0x263   : > { %v1669_v7 = vpop.f32.mrf.mxu3  ;;  %v1772_v50 = vsel %vm1750_vm2, %v1747_v63, -inf }
 0x264   : > { %v1754_v28 = vsel %vm1750_vm2, %v1669_v7, -inf }
 0x265   : > { %1755 = vmax.xlane.f32.xlu1 %v1754_v28 }
 0x26b   : > { %v1693_v58 = vpop.f32.mrf.mxu3 }
 0x26c   : > { %v1757_v12 = vsel %vm1750_vm2, %v1693_v58, -inf }
 0x26d   : > { %1758 = vmax.xlane.f32.xlu0 %v1757_v12 }
 0x273   : > { %v1695_v54 = vpop.f32.mrf.mxu3 }
 0x274   : > { %v1760_v25 = vsel %vm1750_vm2, %v1695_v54, -inf }
 0x275   : > { %1761 = vmax.xlane.f32.xlu1 %v1760_v25  ;;  %1773 = vmax.xlane.f32.xlu0 %v1772_v50 }
 0x27b   : > { %v1719_v38 = vpop.f32.mrf.mxu3 }
 0x27c   : > { %v1763_v19 = vsel %vm1750_vm2, %v1719_v38, -inf }
 0x27d   : > { %1764 = vmax.xlane.f32.xlu2 %v1763_v19 }
 0x283   : > { %v1721_v51 = vpop.f32.mrf.mxu3 }
 0x284   : > { %v1766_v32 = vsel %vm1750_vm2, %v1721_v51, -inf }
 0x285   : > { %1767 = vmax.xlane.f32.xlu2 %v1766_v32 }
 0x28d   : > { %1770 = vmax.xlane.f32.xlu2 %v1769_v44 }
 0x2d0   : > { %v1753_v56 = vpop.xlane.xlu0 %1752 }
 0x2d1   : > { %v1775_v4 = vsub.f32 %v1667_v21, %v1753_v56 }
 0x2d3   : > { %v1783_v10 = vmul.f32 1.442695, %v1775_v4 }
 0x2d5   : > { %3586 = vpow2.f32 %v1783_v10 }
 0x2d8   : > { %v1756_v23 = vpop.xlane.xlu1 %1755 }
 0x2d9   : > { %v1776_v49 = vsub.f32 %v1669_v7, %v1756_v23 }
 0x2db   : > { %v3587_v13 = vpop.eup %3586  ;;  %v1785_v45 = vmul.f32 1.442695, %v1776_v49 }
 0x2dc   : > { %v1799_v53 = vsel %vm1750_vm2, %v3587_v13, 0.0 }
 0x2dd   : > { %3588 = vpow2.f32 %v1785_v45  ;;  %1800 = vadd.xlane.f32.xlu1 %v1799_v53 }
 0x2e0   : > { %v1759_v42 = vpop.xlane.xlu0 %1758 }
 0x2e1   : > { %v1777_v57 = vsub.f32 %v1693_v58, %v1759_v42 }
 0x2e3   : > { %v3589_v59 = vpop.eup %3588  ;;  %v1787_v61 = vmul.f32 1.442695, %v1777_v57 }
 0x2e4   : > { %v1802_v6 = vsel %vm1750_vm2, %v3589_v59, 0.0 }
 0x2e5   : > { %3590 = vpow2.f32 %v1787_v61  ;;  %1803 = vadd.xlane.f32.xlu2 %v1802_v6 }
 0x2e8   : > { %v1774_v18 = vpop.xlane.xlu0 %1773  ;;  %v1762_v1 = vpop.xlane.xlu1 %1761 }
 0x2e9   : > { %v1782_v22 = vsub.f32 %v1747_v63, %v1774_v18  ;;  %v1778_v34 = vsub.f32 %v1695_v54, %v1762_v1 }
 0x2eb   : > { %v3591_v24 = vpop.eup %3590  ;;  %v1797_v52 = vmul.f32 1.442695, %v1782_v22  ;;  %v1789_v46 = vmul.f32 1.442695, %v1778_v34 }
 0x2ec   : > { %v1805_v0 = vsel %vm1750_vm2, %v3591_v24, 0.0 }
 0x2ed   : > { %1806 = vadd.xlane.f32.xlu2 %v1805_v0  ;;  %3592 = vpow2.f32 %v1797_v52 }
 0x2f0   : > { %v1765_v5 = vpop.xlane.xlu2 %1764 }
 0x2f1   : > { %v1779_v35 = vsub.f32 %v1719_v38, %v1765_v5 }
 0x2f3   : > { %v1791_v20 = vmul.f32 1.442695, %v1779_v35  ;;  %v4778_v17 = vpop.eup %3592 }
 0x2f4   : > { %v1820_v26 = vsel %vm1750_vm2, %v4778_v17, 0.0 }
 0x2f5   : > { %3594 = vpow2.f32 %v1791_v20  ;;  %1821 = vadd.xlane.f32.xlu2 %v1820_v26 }
 0x2f6   : > { %3596 = vpow2.f32 %v1789_v46 }
 0x2f8   : > { %v1768_v39 = vpop.xlane.xlu2 %1767 }
 0x2f9   : > { %v1780_v9 = vsub.f32 %v1721_v51, %v1768_v39 }
 0x2fb   : > { %v3595_v16 = vpop.eup %3594  ;;  %v1793_v27 = vmul.f32 1.442695, %v1780_v9 }
 0x2fc   : > { %v1811_v15 = vsel %vm1750_vm2, %v3595_v16, 0.0  ;;  %v3597_v3 = vpop.eup %3596 }
 0x2fd   : > { %3598 = vpow2.f32 %v1793_v27  ;;  %1812 = vadd.xlane.f32.xlu0 %v1811_v15  ;;  %v1808_v36 = vsel %vm1750_vm2, %v3597_v3, 0.0 }
 0x300   : > { %v1771_v8 = vpop.xlane.xlu2 %1770 }
 0x301   : > { %v1781_v43 = vsub.f32 %v4766_v11, %v1771_v8 }
 0x303   : > { %v3599_v2 = vpop.eup %3598  ;;  %v1795_v47 = vmul.f32 1.442695, %v1781_v43 }
 0x304   : > { %v1814_v30 = vsel %vm1750_vm2, %v3599_v2, 0.0 }
 0x305   : > { %3600 = vpow2.f32 %v1795_v47  ;;  %1809 = vadd.xlane.f32.xlu0 %v1808_v36  ;;  %1815 = vadd.xlane.f32.xlu1 %v1814_v30 }
 0x30b   : > { %v3601_v31 = vpop.eup %3600 }
 0x30c   : > { %v1817_v37 = vsel %vm1750_vm2, %v3601_v31, 0.0 }
 0x30d   : > { %1818 = vadd.xlane.f32.xlu1 %v1817_v37 }
 0x350   : > { %v1801_v60 = vpop.xlane.xlu1 %1800 }
 0x351   : > { %3602 = vrcp.f32 %v1801_v60 }
 0x357   : > { %v3603_v48 = vpop.eup %3602 }
 0x358   : > { %v1804_v62 = vpop.xlane.xlu2 %1803  ;;  %v1831_v14 = vmul.f32 %v3603_v48, %v3587_v13 }
 0x359   : > { %3604 = vrcp.f32 %v1804_v62 }
 0x35a   : > { %v1839_v55 = vpack.c.bf16 %v1831_v14, %v1831_v14 }
 0x35c   : > { %v1849_v7 = vunpack.c.l.b16 %v1839_v55 }
 0x35f   : > { %v3605_v29 = vpop.eup %3604 }
 0x360   : > { %v1832_v21 = vmul.f32 %v3605_v29, %v3589_v59  ;;  %v1807_v58 = vpop.xlane.xlu2 %1806 }
 0x361   : > { %3606 = vrcp.f32 %v1807_v58 }
 0x362   : > { %v1840_v41 = vpack.c.bf16 %v1832_v21, %v1832_v21 }
 0x364   : > { %v1850_v28 = vunpack.c.l.b16 %v1840_v41 }
 0x366   : > { %v1851_v11 = vpack.c.b16 %v1850_v28, %v1849_v7 }
 0x367   : > { %v3607_v50 = vpop.eup %3606 }
 0x368   : > { %3184 = vmatmul.msk.bf16.vlgmr.msrb.gmra.mxu2 %vm1750_vm2, %v1851_v11  ;;  %v1822_v63 = vpop.xlane.xlu2 %1821  ;;  %v1833_v19 = vmul.f32 %v3607_v50, %v3591_v24 }
 0x36a   : > { %v1841_v56 = vpack.c.bf16 %v1833_v19, %v1833_v19 }
 0x36c   : > { %v1875_v42 = vunpack.c.l.b16 %v1841_v56 }
 0x370   : > { %v1813_v12 = vpop.xlane.xlu0 %1812 }
 0x371   : > { %3608 = vrcp.f32 %v1813_v12 }
 0x377   : > { %v3609_v38 = vpop.eup %3608 }
 0x378   : > { %v1810_v54 = vpop.xlane.xlu0 %1809  ;;  %v1816_v25 = vpop.xlane.xlu1 %1815  ;;  %v1835_v51 = vmul.f32 %v3609_v38, %v3595_v16 }
 0x379   : > { %3610 = vrcp.f32 %v1810_v54 }
 0x37a   : > { %3612 = vrcp.f32 %v1816_v25  ;;  %v1843_v49 = vpack.c.bf16 %v1835_v51, %v1835_v51 }
 0x37b   : > { %3614 = vrcp.f32 %v1822_v63 }
 0x37c   : > { %v1901_v61 = vunpack.c.l.b16 %v1843_v49 }
 0x37f   : > { %v3611_v32 = vpop.eup %3610 }
 0x380   : > { %v3613_v44 = vpop.eup %3612  ;;  %v1834_v4 = vmul.f32 %v3611_v32, %v3597_v3  ;;  %v1819_v10 = vpop.xlane.xlu1 %1818 }
 0x381   : > { %v3615_v23 = vpop.eup %3614  ;;  %v1836_v13 = vmul.f32 %v3613_v44, %v3599_v2  ;;  %3616 = vrcp.f32 %v1819_v10 }
 0x382   : > { %v1842_v45 = vpack.c.bf16 %v1834_v4, %v1834_v4  ;;  %v1838_v57 = vmul.f32 %v3615_v23, %v4778_v17 }
 0x383   : > { %v1844_v53 = vpack.c.bf16 %v1836_v13, %v1836_v13 }
 0x384   : > { %v1876_v59 = vunpack.c.l.b16 %v1842_v45  ;;  %v1846_v52 = vpack.c.bf16 %v1838_v57, %v1838_v57 }
 0x385   : > { %v1902_v6 = vunpack.c.l.b16 %v1844_v53 }
 0x386   : > { %v1877_v18 = vpack.c.b16 %v1876_v59, %v1875_v42  ;;  %v1928_v5 = vunpack.c.l.b16 %v1846_v52 }
 0x387   : > { %v3617_v22 = vpop.eup %3616  ;;  %v1903_v24 = vpack.c.b16 %v1902_v6, %v1901_v61 }
 0x388   : > { %v1837_v0 = vmul.f32 %v3617_v22, %v3601_v31  ;;  %3185 = vmatmul.msk.bf16.vlgmr.msra.gmra.mxu2 %vm1750_vm2, %v1877_v18 }
 0x389   : > { %3186 = vmatmul.msk.bf16.vlgmr.msrb.gmra.mxu3 %vm1750_vm2, %v1903_v24 }
 0x38a   : > { %v1845_v1 = vpack.c.bf16 %v1837_v0, %v1837_v0 }
 0x38c   : > { %v1927_v35 = vunpack.c.l.b16 %v1845_v1 }
 0x38e   : > { %v1929_v34 = vpack.c.b16 %v1928_v5, %v1927_v35 }
 0x390   : > { %3187 = vmatmul.msk.bf16.vlgmr.msra.gmra.mxu0 %vm1750_vm2, %v1929_v34 }
 0x3eb   : > { %v1868_v20 = vpop.f32.mrf.mxu2 }
 0x3ec   : > { %v1954_v26 = vrot.slane %v1868_v20, 4 }
 0x3f3   : > { %v1870_v17 = vpop.f32.mrf.mxu2 }
 0x3f4   : > { %v2010_v41 = vrot.slane %v1870_v17, 4 }
 0x40b   : > { %v1894_v46 = vpop.f32.mrf.mxu2 }
 0x40c   : > { %v1966_v39 = vrot.slane %v1894_v46, 4  ;;  %v1920_v9 = vpop.f32.mrf.mxu3 }
 0x40d   : > { %v1951_v16 = vrot.slane %v1920_v9, 4  ;;  %v1955_v27 = vsel %vm971_vm0, %v1920_v9, %v1954_v26  ;;  %v1946_v15 = vpop.f32.mrf.mxu0 }
 0x40e   : > { %v1963_v8 = vperm.slane %v1955_v27, %v4320_v33  ;;  %v1964_v3 = vrot.slane %v1946_v15, 4  ;;  %v1967_v43 = vsel %vm971_vm0, %v1946_v15, %v1966_v39 }
 0x40f   : > { %v1953_v2 = vsel %vm971_vm0, %v1951_v16, %v1868_v20  ;;  %v1975_v47 = vperm.slane %v1967_v43, %v4320_v33 }
 0x410   : > { %v1959_v36 = vperm.slane %v1953_v2, %v4320_v33  ;;  %v1990_v30 = vrot.slane %v1963_v8, 4  ;;  %v1965_v31 = vsel %vm971_vm0, %v1964_v3, %v1894_v46 }
 0x411   : > { %v1971_v37 = vperm.slane %v1965_v31, %v4320_v33  ;;  %v1988_v60 = vrot.slane %v1975_v47, 4 }
 0x412   : > { %v1978_v62 = vrot.slane %v1959_v36, 4  ;;  %v1991_v48 = vsel %vm971_vm0, %v1975_v47, %v1990_v30 }
 0x413   : > { %v1976_v14 = vrot.slane %v1971_v37, 4  ;;  %v1989_v29 = vsel %vm971_vm0, %v1988_v60, %v1963_v8  ;;  %v1999_v55 = vperm.slane %v1991_v48, %v4328_v40  ;;  %v1896_v21 = vpop.f32.mrf.mxu2 }
 0x414   : > { %v1979_v7 = vsel %vm971_vm0, %v1971_v37, %v1978_v62  ;;  %v1995_v28 = vperm.slane %v1989_v29, %v4328_v40  ;;  %v2022_v11 = vrot.slane %v1896_v21, 4  ;;  %v1922_v58 = vpop.f32.mrf.mxu3 }
 0x415   : > { %v1977_v12 = vsel %vm971_vm0, %v1976_v14, %v1959_v36  ;;  %v1987_v63 = vperm.slane %v1979_v7, %v4328_v40  ;;  %v2006_v54 = vrot.slane %v1999_v55, 4  ;;  %v2008_v25 = vrot.slane %v1922_v58, 4  ;;  %v1948_v50 = vpop.f32.mrf.mxu0 }
 0x416   : > { %v1983_v38 = vperm.slane %v1977_v12, %v4328_v40  ;;  %v2004_v19 = vrot.slane %v1995_v28, 4  ;;  %v2011_v51 = vsel %vm971_vm0, %v1922_v58, %v2010_v41  ;;  %v2020_v32 = vrot.slane %v1948_v50, 4 }
 0x417   : > { %v2002_v44 = vrot.slane %v1987_v63, 4  ;;  %v2007_v56 = vsel %vm971_vm0, 0.0, %v2006_v54  ;;  %v2075_v4 = vsel %vm971_vm0, %v2006_v54, %v1995_v28  ;;  %v2009_v10 = vsel %vm971_vm0, %v2008_v25, %v1870_v17 }
 0x418   : > { %v2000_v23 = vrot.slane %v1983_v38, 4  ;;  %v2005_v49 = vsel %vm971_vm0, 0.0, %v2004_v19  ;;  %v2079_v13 = vperm.slane %v2075_v4, %v4320_v33  ;;  %v2080_v45 = vrot.slane %v2007_v56, 4 }
 0x419   : > { %v2003_v53 = vsel %vm971_vm0, 0.0, %v2002_v44  ;;  %v2064_v42 = vsel %vm971_vm0, %v2002_v44, %v1983_v38  ;;  %v2015_v57 = vperm.slane %v2009_v10, %v4320_v33  ;;  %v2019_v59 = vperm.slane %v2011_v51, %v4320_v33 }
 0x41a   : > { %v2069_v61 = vrot.slane %v2003_v53, 4  ;;  %v2081_v6 = vsel %vm971_vm0, %v2080_v45, %v2005_v49  ;;  %v2100_v18 = vrot.slane %v2079_v13, 4  ;;  %v2021_v22 = vsel %vm971_vm0, %v2020_v32, %v1896_v21 }
 0x41b   : > { %v2085_v24 = vperm.slane %v2081_v6, %v4320_v33  ;;  %v2034_v52 = vrot.slane %v2015_v57, 4  ;;  %v2046_v0 = vrot.slane %v2019_v59, 4  ;;  %v2023_v1 = vsel %vm971_vm0, %v1948_v50, %v2022_v11 }
 0x41c   : > { %v2027_v5 = vperm.slane %v2021_v22, %v4320_v33  ;;  %v2031_v35 = vperm.slane %v2023_v1, %v4320_v33  ;;  %v2001_v34 = vsel %vm971_vm0, 0.0, %v2000_v23  ;;  %v2068_v20 = vperm.slane %v2064_v42, %v4320_v33 }
 0x41d   : > { %v2070_v17 = vsel %vm971_vm0, %v2069_v61, %v2001_v34  ;;  %v2101_v26 = vsel %vm971_vm0, %v2085_v24, %v2100_v18  ;;  %v2098_v46 = vrot.slane %v2085_v24, 4 }
 0x41e   : > { %v2032_v39 = vrot.slane %v2027_v5, 4  ;;  %v2035_v9 = vsel %vm971_vm0, %v2027_v5, %v2034_v52  ;;  %v2044_v16 = vrot.slane %v2031_v35, 4  ;;  %v2047_v27 = vsel %vm971_vm0, %v2031_v35, %v2046_v0 }
 0x41f   : > { %v2043_v15 = vperm.slane %v2035_v9, %v4328_v40  ;;  %v2055_v8 = vperm.slane %v2047_v27, %v4328_v40  ;;  %v2074_v3 = vperm.slane %v2070_v17, %v4320_v33  ;;  %v2088_v43 = vrot.slane %v2068_v20, 4 }
 0x420   : > { %v2033_v2 = vsel %vm971_vm0, %v2032_v39, %v2015_v57  ;;  %v2045_v47 = vsel %vm971_vm0, %v2044_v16, %v2019_v59  ;;  %v2099_v36 = vsel %vm971_vm0, %v2098_v46, %v2079_v13  ;;  %v2109_v48 = vperm.slane %v2101_v26, %v4328_v40 }
 0x421   : > { %v2039_v30 = vperm.slane %v2033_v2, %v4328_v40  ;;  %v2051_v31 = vperm.slane %v2045_v47, %v4328_v40  ;;  %v2058_v37 = vrot.slane %v2043_v15, 4  ;;  %v2062_v60 = vrot.slane %v2055_v8, 4  ;;  %v3390_v8 = vld [vmem:[#allocation11 + $0x38] sm:$0xff]  ;;  %v3387_v2 = vld [vmem:[#allocation11 + $0x20] sm:$0xff] }
 0x422   : > { %v2089_v62 = vsel %vm971_vm0, %v2074_v3, %v2088_v43  ;;  %v2086_v14 = vrot.slane %v2074_v3, 4  ;;  %v2105_v29 = vperm.slane %v2099_v36, %v4328_v40  ;;  %v2114_v42 = vrot.slane %v2109_v48, 4  ;;  %2273 = vmatpush.bf16.msrb.mxu1 %v3390_v8  ;;  %v3389_v3 = vld [vmem:[#allocation11 + $0x30] sm:$0xff]  ;;  %v3388_v43 = vld [vmem:[#allocation11 + $0x28] sm:$0xff]  ;;  %v3386_v47 = vld [vmem:[#allocation11 + $0x18] sm:$0xff] }
 0x423   : > { %v2056_v55 = vrot.slane %v2039_v30, 4  ;;  %v2059_v21 = vsel %vm971_vm0, 0.0, %v2058_v37  ;;  %v2060_v41 = vrot.slane %v2051_v31, 4  ;;  %v2063_v7 = vsel %vm971_vm0, 0.0, %v2062_v60  ;;  %v3385_v36 = vld [vmem:[#allocation11 + $0x10] sm:$0xff] }
 0x424   : > { %v2118_v28 = vsel %vm971_vm0, %v2058_v37, %v2039_v30  ;;  %v2123_v11 = vrot.slane %v2059_v21, 4  ;;  %v2129_v58 = vsel %vm971_vm0, %v2062_v60, %v2051_v31  ;;  %v2134_v12 = vrot.slane %v2063_v7, 4  ;;  %v3384_v30 = vld [vmem:[#allocation11 + $0x8] sm:$0xff]  ;;  %v3383_v31 = vld [vmem:[#allocation11] sm:$0xff]  ;;  %v3264_v8 = vld [vmem:[#allocation13 + $0x58] sm:$0xf0] }
 0x425   : > { %v2061_v63 = vsel %vm971_vm0, 0.0, %v2060_v41  ;;  %v2133_v54 = vperm.slane %v2129_v58, %v4320_v33  ;;  %v2057_v25 = vsel %vm971_vm0, 0.0, %v2056_v55  ;;  %v2097_v50 = vperm.slane %v2089_v62, %v4328_v40 }
 0x426   : > { %v2135_v38 = vsel %vm971_vm0, %v2134_v12, %v2061_v63  ;;  %v2122_v19 = vperm.slane %v2118_v28, %v4320_v33  ;;  %v2124_v51 = vsel %vm971_vm0, %v2123_v11, %v2057_v25  ;;  %v2087_v32 = vsel %vm971_vm0, %v2086_v14, %v2068_v20  ;;  %2274 = vmatpush.bf16.msrb.mxu1 %v3389_v3  ;;  %v3580_v25 = vld [vmem:[%s5100_s7] ss:$0 sm:$0xff] }
 0x427   : > { %v2139_v44 = vperm.slane %v2135_v38, %v4320_v33  ;;  %v2154_v56 = vrot.slane %v2133_v54, 4  ;;  %v2128_v4 = vperm.slane %v2124_v51, %v4320_v33  ;;  %v2093_v23 = vperm.slane %v2087_v32, %v4328_v40 }
 0x428   : > { %v2142_v10 = vrot.slane %v2122_v19, 4  ;;  %v2110_v49 = vrot.slane %v2105_v29, 4  ;;  %v2116_v61 = vrot.slane %v2097_v50, 4  ;;  %v2115_v35 = vsel %vm971_vm0, %v2114_v42, %v2097_v50 }
 0x429   : > { %v2155_v13 = vsel %vm971_vm0, %v2139_v44, %v2154_v56  ;;  %v2140_v45 = vrot.slane %v2128_v4, 4  ;;  %v2152_v53 = vrot.slane %v2139_v44, 4  ;;  %v2112_v52 = vrot.slane %v2093_v23, 4  ;;  %v3637_v56 = vld [vmem:[%s4241_s30 + $0x8] sm:$0xff] }
 0x42a   : > { %v2143_v57 = vsel %vm971_vm0, %v2128_v4, %v2142_v10  ;;  %v2163_v59 = vperm.slane %v2155_v13, %v4328_v40  ;;  %v2111_v22 = vsel %vm971_vm0, %v2110_v49, %v2093_v23  ;;  %v2117_v46 = vsel %vm971_vm0, %v2109_v48, %v2116_v61  ;;  %2275 = vmatpush.bf16.msrb.mxu1 %v3388_v43  ;;  %v3254_v43 = vld [vmem:[#allocation13 + $0x40] sm:$0xf] }
 0x42b   : > { %v2151_v6 = vperm.slane %v2143_v57, %v4328_v40  ;;  %v2141_v18 = vsel %vm971_vm0, %v2140_v45, %v2122_v19  ;;  %v2153_v33 = vsel %vm971_vm0, %v2152_v53, %v2133_v54  ;;  %v2113_v16 = vsel %vm971_vm0, %v2105_v29, %v2112_v52  ;;  %v3636_v19 = vld [vmem:[%s4241_s30] sm:$0xff]  ;;  %s5159_s30 = sld [smem:[#allocation39_spill]] }
 0x42c   : > { %v2168_v24 = vrot.slane %v2163_v59, 4  ;;  %v2147_v0 = vperm.slane %v2141_v18, %v4328_v40  ;;  %v2159_v1 = vperm.slane %v2153_v33, %v4328_v40  ;;  %v3997_v10 = vmov 128.0   ;;  %v3278_v52 = vld [vmem:[#allocation13 + $0x70] sm:$0xf] }
 0x42d   : > { %v2170_v5 = vrot.slane %v2151_v6, 4  ;;  %3618 = vrcp.f32 %v3997_v10 }
 0x42e   : > { %v2169_v34 = vsel %vm971_vm0, %v2168_v24, %v2151_v6  ;;  %v2164_v20 = vrot.slane %v2159_v1, 4  ;;  %v2166_v17 = vrot.slane %v2147_v0, 4  ;;  %2276 = vmatpush.bf16.msrb.mxu1 %v3387_v2  ;;  %v3400_v2 = vld [vmem:[#allocation13 + $0x44] sm:$0xf0] }
 0x42f   : > { %v3569_v26 = vpack.i.bf16 %v2169_v34, %v2115_v35  ;;  %v2171_v39 = vsel %vm971_vm0, %v2163_v59, %v2170_v5  ;;  %v3280_v35 = vld [vmem:[#allocation13 + $0x78] sm:$0xf0] }
 0x430   : > { %v3574_v9 = vpack.i.bf16 %v2171_v39, %v2117_v46  ;;  %v2167_v27 = vsel %vm971_vm0, %v2159_v1, %v2166_v17  ;;  %v2165_v15 = vsel %vm971_vm0, %v2164_v20, %v2147_v0  ;;  %v3406_v0 = vld [vmem:[#allocation13 + $0x74] sm:$0xf0]  ;;  %v3405_v1 = vld [vmem:[#allocation13 + $0x74] sm:$0xf]  ;;  %v3270_v20 = vld [vmem:[#allocation13 + $0x60] sm:$0xf] }
 0x431   : > { %3570 = vrot.lane.b32.xlu1 %v3569_v26, %s3993_s2  ;;  %v3564_v40 = vpack.i.bf16 %v2167_v27, %v2113_v16  ;;  %v3279_v5 = vor.u32 %v3406_v0, %v3278_v52  ;;  %v3283_v34 = vor.u32 %v3405_v1, %v3280_v35  ;;  %v3404_v17 = vld [vmem:[#allocation13 + $0x64] sm:$0xf0]  ;;  %v3403_v26 = vld [vmem:[#allocation13 + $0x64] sm:$0xf]  ;;  %v3272_v39 = vld [vmem:[#allocation13 + $0x68] sm:$0xf0] }
 0x432   : > { %3575 = vrot.lane.b32.xlu2 %v3574_v9, %s3994_s9  ;;  %2277 = vmatpush.bf16.msrb.mxu1 %v3386_v47  ;;  %v3271_v46 = vor.u32 %v3404_v17, %v3270_v20  ;;  %v3275_v9 = vor.u32 %v3403_v26, %v3272_v39  ;;  %v3262_v16 = vld [vmem:[#allocation13 + $0x50] sm:$0xf]  ;;  %v3402_v27 = vld [vmem:[#allocation13 + $0x54] sm:$0xf0]  ;;  %v3399_v47 = vld [vmem:[#allocation13 + $0x44] sm:$0xf] }
 0x433   : > { %3565 = vrot.lane.b32.xlu0 %v3564_v40, %s3992_s29  ;;  %v3619_v23 = vpop.eup %3618  ;;  %2451 = vmatpush.bf16.msrb.mxu2 %v3279_v5  ;;  %v3263_v40 = vor.u32 %v3402_v27, %v3262_v16  ;;  %v3581_v20 = vld [vmem:[%s5101_s8] ss:$0 sm:$0xff]  ;;  %s5162_s2 = sld [smem:[#allocation41_spill]]  ;;  %s3423_s9 = sshll.u32 %s5160_s23, 4 }
 0x434   : > { %v2296_v49 = vmul.f32 128.0, %v3619_v23  ;;  %vm2300_vm5 = vweird.f32 %v3619_v23  ;;  %2465 = vmatpush.bf16.msra.mxu3 %v3283_v34  ;;  %s2887_s28 = scalar_lea.hbm %s5163_s20, %s3423_s9 }
 0x436   : > { %2278 = vmatpush.bf16.msrb.mxu1 %v3385_v36  ;;  %v2297_v13 = vsub.f32 1.0, %v2296_v49  ;;  %v3392_v49 = vld [vmem:[#allocation13 + $0x4] sm:$0xf0] }
 0x437   : > { %2452 = vmatpush.bf16.msrb.mxu2 %v3271_v46 }
 0x438   : > { %v2298_v45 = vmul.f32 %v3619_v23, %v2297_v13  ;;  %2466 = vmatpush.bf16.msra.mxu3 %v3275_v9  ;;  %v3582_v9 = vld [vmem:[%s5155_s19] ss:$0 sm:$0xff]  ;;  %s2890_s19 = sshll.u32 %s2887_s28, 4  ;;  %s2891_s19 = int_to_ptr.hbm [resolvable:$true] %s2890_s19 }
 0x439   : > { %s3892_s18 = sshra.s32 %s2891_s19, 4  ;;  %s3893_s18 = int_to_ptr.hbm [resolvable:$true] %s3892_s18 }
 0x43a   : > { %2279 = vmatpush.bf16.msrb.mxu1 %v3384_v30  ;;  %v2299_v53 = vadd.f32 %v3619_v23, %v2298_v45  ;;  %v3255_v30 = vor.u32 %v3400_v2, %v3254_v43  ;;  %v3391_v45 = vld [vmem:[#allocation13 + $0x4] sm:$0xf]  ;;  %p3899_p10 = scmp.lt.s32.totalorder %s3893_s18, %s5163_s20 }
 0x43b   : > { %2453 = vmatpush.bf16.msrb.mxu2 %v3263_v40  ;;  %v2365_v40 = vld [vmem:[%s5156_s15] sm:$0x3]  ;;  %s3894_s15 = scalar_lea.hbm %s3893_s18, 16 }
 0x43c   : > { %v4882_v42 = vsel %vm2300_vm5, %v3619_v23, %v2299_v53  ;;  %v3222_v23 = vld [vmem:[#allocation13] sm:$0xf]  ;;  %v3224_v53 = vld [vmem:[#allocation13 + $0x8] sm:$0xf0]  ;;  %p3895_p1 = scmp.ne.s32.totalorder %s3893_s18, %s3894_s15  ;;  %p3900_p11 = scmp.lt.s32.totalorder %s3898_s6, %s3894_s15 }
 0x43e   : > { %2280 = vmatpush.bf16.msrb.mxu1 %v3383_v31  ;;  %v3256_v31 = vld [vmem:[#allocation13 + $0x48] sm:$0xf0]  ;;  %p3896_p3 = pnand %p3895_p1, %p4202_p2  ;;  %p3901_p12 = por %p3900_p11, %p3899_p10 }
 0x43f   : > { %2454 = vmatpush.bf16.msrb.mxu2 %v3255_v30 }
 0x440   : > { %p3897_p9 = pneg %p3896_p3 }
 0x442   : > { %p3902_p13 = pnand %p3901_p12, %p3897_p9 }
 0x48c   : > { %v3576_v60 = vpop.permute.xlu2 %3575 }
 0x48d   : > { %v3578_v21 = vunpack.i.h.bf16 %v3576_v60  ;;  %v3577_v41 = vunpack.i.l.bf16 %v3576_v60  ;;  %v3259_v60 = vor.u32 %v3399_v47, %v3256_v31 }
 0x4a3   : > { %v3571_v37 = vpop.permute.xlu1 %3570 }
 0x4a4   : > { %v3573_v29 = vunpack.i.h.bf16 %v3571_v37  ;;  %v3572_v55 = vunpack.i.l.bf16 %v3571_v37 }
 0x4a5   : > { %v3566_v62 = vpop.permute.xlu0 %3565 }
 0x4a6   : > { %v3568_v48 = vunpack.i.h.bf16 %v3566_v62  ;;  %v3567_v14 = vunpack.i.l.bf16 %v3566_v62  ;;  %v3246_v62 = vld [vmem:[#allocation13 + $0x30] sm:$0xf] }
 0x4a8   : > { %v2196_v7 = vsel %vm1651_vm1, %v2111_v22, %v3567_v14  ;;  %v2197_v28 = vsel %vm1651_vm1, %v2165_v15, %v3568_v48  ;;  %v3401_v15 = vld [vmem:[#allocation13 + $0x54] sm:$0xf]  ;;  %v3398_v48 = vld [vmem:[#allocation13 + $0x34] sm:$0xf0] }
 0x4a9   : > { %v2199_v11 = vsel %vm2198_vm3, %v2196_v7, %v3572_v55  ;;  %v2200_v58 = vsel %vm2198_vm3, %v2197_v28, %v3573_v29  ;;  %v3267_v3 = vor.u32 %v3401_v15, %v3264_v8  ;;  %v3397_v14 = vld [vmem:[#allocation13 + $0x34] sm:$0xf]  ;;  %v3248_v29 = vld [vmem:[#allocation13 + $0x38] sm:$0xf0]  ;;  %v3238_v7 = vld [vmem:[#allocation13 + $0x20] sm:$0xf] }
 0x4aa   : > { %v2202_v12 = vsel %vm2201_vm4, %v2199_v11, %v3577_v41  ;;  %v2203_v63 = vsel %vm2201_vm4, %v2200_v58, %v3578_v21  ;;  %v3247_v21 = vor.u32 %v3398_v48, %v3246_v62  ;;  %v3251_v41 = vor.u32 %v3397_v14, %v3248_v29  ;;  %v3396_v28 = vld [vmem:[#allocation13 + $0x24] sm:$0xf0]  ;;  %v3395_v11 = vld [vmem:[#allocation13 + $0x24] sm:$0xf]  ;;  %v3240_v58 = vld [vmem:[#allocation13 + $0x28] sm:$0xf0] }
 0x4ab   : > { %v2204_v54 = vpack.c.bf16 %v2203_v63, %v2202_v12  ;;  %2467 = vmatpush.bf16.msra.mxu3 %v3267_v3  ;;  %v3239_v63 = vor.u32 %v3396_v28, %v3238_v7  ;;  %v2368_v8 = vperm.slane %v2365_v40, 1 }
 0x4ac   : > { %2455 = vmatpush.bf16.msrb.mxu2 %v3247_v21 }
 0x4ad   : > { %2281 = vmatmul.bf16.vlgmr.msrb.gmra.mxu1 %v2204_v54 }
 0x4af   : > { %2468 = vmatpush.bf16.msra.mxu3 %v3259_v60 }
 0x4b0   : > { %2456 = vmatpush.bf16.msrb.mxu2 %v3239_v63 }
 0x4b3   : > { %2469 = vmatpush.bf16.msra.mxu3 %v3251_v41 }
 0x52a   : > { %v2282_v50 = vpop.f32.mrf.mxu1 }
 0x52b   : > { %v2283_v38 = vadd.f32 %v3580_v25, %v2282_v50  ;;  %v3230_v50 = vld [vmem:[#allocation13 + $0x10] sm:$0xf] }
 0x52d   : > { %v2287_v51 = vadd.f32 %v3636_v19, %v2283_v38  ;;  %v3394_v38 = vld [vmem:[#allocation13 + $0x14] sm:$0xf0]  ;;  %v3393_v19 = vld [vmem:[#allocation13 + $0x14] sm:$0xf] }
 0x52f   : > { %2291 = vadd.xlane.f32.xlu0 %v2287_v51 }
 0x532   : > { %v2284_v32 = vpop.f32.mrf.mxu1 }
 0x533   : > { %v2285_v44 = vadd.f32 %v3580_v25, %v2284_v32  ;;  %v3243_v25 = vor.u32 %v3395_v11, %v3240_v58 }
 0x535   : > { %v2288_v4 = vadd.f32 %v3637_v56, %v2285_v44  ;;  %2470 = vmatpush.bf16.msra.mxu3 %v3243_v25 }
 0x537   : > { %2293 = vadd.xlane.f32.xlu1 %v2288_v4 }
 0x5a2   : > { %v2292_v57 = vpop.xlane.xlu0 %2291 }
 0x5a3   : > { %v2302_v59 = vmul.f32 %v4882_v42, %v2292_v57 }
 0x5a5   : > { %v4885_v61 = vsub.f32 %v2287_v51, %v2302_v59  ;;  %v3232_v51 = vld [vmem:[#allocation13 + $0x18] sm:$0xf0]  ;;  %v3223_v59 = vor.u32 %v3392_v49, %v3222_v23 }
 0x5a6   : > { %v3235_v10 = vor.u32 %v3393_v19, %v3232_v51 }
 0x5a7   : > { %v2306_v6 = vmul.f32 %v4885_v61, %v4885_v61 }
 0x5a8   : > { %2471 = vmatpush.bf16.msra.mxu3 %v3235_v10  ;;  %v3422_v10 = vld [vmem:[#allocation14 + $0x78] sm:$0xff] }
 0x5a9   : > { %2308 = vadd.xlane.f32.xlu2 %v2306_v6  ;;  %v3227_v6 = vor.u32 %v3391_v45, %v3224_v53  ;;  %2803 = vmatpush.bf16.msra.mxu1 %v3422_v10 }
 0x5aa   : > { %v2294_v18 = vpop.xlane.xlu1 %2293 }
 0x5ab   : > { %v2303_v33 = vmul.f32 %v4882_v42, %v2294_v18 }
 0x5ac   : > { %2472 = vmatpush.bf16.msra.mxu3 %v3227_v6 }
 0x5ad   : > { %v4890_v22 = vsub.f32 %v2288_v4, %v2303_v33  ;;  %v3231_v4 = vor.u32 %v3394_v38, %v3230_v50 }
 0x5af   : > { %v2307_v24 = vmul.f32 %v4890_v22, %v4890_v22  ;;  %2457 = vmatpush.bf16.msrb.mxu2 %v3231_v4  ;;  %v3414_v4 = vld [vmem:[#allocation14 + $0x38] sm:$0xff] }
 0x5b0   : > { %2789 = vmatpush.bf16.msrb.mxu0 %v3414_v4 }
 0x5b1   : > { %2310 = vadd.xlane.f32.xlu0 %v2307_v24 }
 0x5b3   : > { %2458 = vmatpush.bf16.msrb.mxu2 %v3223_v59 }
 0x61c   : > { %v2309_v36 = vpop.xlane.xlu2 %2308 }
 0x61d   : > { %v2312_v37 = vmul.f32 %v2309_v36, %v4882_v42 }
 0x61f   : > { %v2314_v55 = vadd.f32 1e-12, %v2312_v37 }
 0x621   : > { %3620 = vrsqrt.f32 %v2314_v55  ;;  %vm2322_vm7 = vweird.f32 %v2314_v55 }
 0x624   : > { %v2311_v12 = vpop.xlane.xlu0 %2310 }
 0x625   : > { %v2313_v54 = vmul.f32 %v2311_v12, %v4882_v42 }
 0x627   : > { %v3621_v32 = vpop.eup %3620  ;;  %v2315_v44 = vadd.f32 1e-12, %v2313_v54 }
 0x628   : > { %v2317_v56 = vmul.f32 %v3621_v32, %v2314_v55  ;;  %vm2323_vm6 = vweird.f32 %v3621_v32 }
 0x629   : > { %3622 = vrsqrt.f32 %v2315_v44  ;;  %vm2324_vm8 = vmor %vm2322_vm7, %vm2323_vm6  ;;  %vm2332_vm10 = vweird.f32 %v2315_v44 }
 0x62a   : > { %v2318_v13 = vmul.f32 %v3621_v32, %v2317_v56 }
 0x62c   : > { %v2319_v57 = vmul.f32 0.5, %v2318_v13 }
 0x62e   : > { %v2320_v18 = vsub.f32 1.5, %v2319_v57 }
 0x62f   : > { %v3623_v33 = vpop.eup %3622 }
 0x630   : > { %v2321_v24 = vmul.f32 %v3621_v32, %v2320_v18  ;;  %v2327_v52 = vmul.f32 %v3623_v33, %v2315_v44  ;;  %vm2333_vm9 = vweird.f32 %v3623_v33 }
 0x631   : > { %vm2334_vm11 = vmor %vm2332_vm10, %vm2333_vm9 }
 0x632   : > { %v2328_v0 = vmul.f32 %v3623_v33, %v2327_v52  ;;  %v2325_v1 = vsel %vm2324_vm8, %v3621_v32, %v2321_v24 }
 0x633   : > { %v2336_v34 = vmul.f32 %v2325_v1, %v4885_v61 }
 0x634   : > { %v2329_v5 = vmul.f32 0.5, %v2328_v0 }
 0x635   : > { %v2341_v39 = vmul.f32 %v3581_v20, %v2336_v34 }
 0x636   : > { %v2330_v35 = vsub.f32 1.5, %v2329_v5  ;;  %v3413_v5 = vld [vmem:[#allocation14 + $0x30] sm:$0xff] }
 0x637   : > { %v4904_v27 = vadd.f32 %v3582_v9, %v2341_v39  ;;  %2790 = vmatpush.bf16.msrb.mxu0 %v3413_v5 }
 0x638   : > { %v2331_v17 = vmul.f32 %v3623_v33, %v2330_v35  ;;  %v3421_v35 = vld [vmem:[#allocation14 + $0x70] sm:$0xff] }
 0x639   : > { %2804 = vmatpush.bf16.msra.mxu1 %v3421_v35 }
 0x63a   : > { %v2335_v26 = vsel %vm2334_vm11, %v3623_v33, %v2331_v17 }
 0x63b   : > { %v2337_v46 = vmul.f32 %v2335_v26, %v4890_v22  ;;  %v2367_v22 = vperm.slane %v2365_v40, 0 }
 0x63d   : > { %v2342_v16 = vmul.f32 %v3581_v20, %v2337_v46 }
 0x63f   : > { %v4906_v15 = vadd.f32 %v3582_v9, %v2342_v16 }
 0x641   : > { %v2348_v61 = vpack.c.bf16 %v4906_v15, %v4904_v27 }
 0x643   : > { %2459 = vmatmul.bf16.vlgmr.msrb.gmra.mxu2 %v2348_v61  ;;  %2473 = vmatmul.bf16.vlgmr.msra.gmra.mxu3 %v2348_v61 }
 0x6c6   : > { %v2460_v3 = vpop.f32.mrf.mxu2  ;;  %v2474_v43 = vpop.f32.mrf.mxu3 }
 0x6c7   : > { %v4913_v2 = vadd.f32 %v2460_v3, %v2367_v22  ;;  %v4915_v47 = vadd.f32 %v2474_v43, %v2368_v8  ;;  %v3420_v3 = vld [vmem:[#allocation14 + $0x68] sm:$0xff] }
 0x6c8   : > { %2805 = vmatpush.bf16.msra.mxu1 %v3420_v3 }
 0x6c9   : > { %v4918_v36 = vmul.f32 0.70710677, %v4913_v2  ;;  %v4921_v30 = vmul.f32 0.70710677, %v4915_v47 }
 0x6cb   : > { %v2487_v31 = vmul.f32 %v4918_v36, %v4918_v36  ;;  %v2527_v37 = vmul.f32 %v4921_v30, %v4921_v30 }
 0x6cd   : > { %v4927_v60 = vmin.f32 %v2487_v31, 16.0  ;;  %v4929_v62 = vmin.f32 %v2527_v37, 16.0 }
 0x6ce   : > { %v2462_v48 = vpop.f32.mrf.mxu2  ;;  %v2476_v14 = vpop.f32.mrf.mxu3 }
 0x6cf   : > { %v2489_v29 = vmul.f32 2.1237322e-06, %v4927_v60  ;;  %v2500_v55 = vmul.f32 3.8918573e-05, %v4927_v60  ;;  %v4933_v21 = vadd.f32 %v2462_v48, %v2367_v22  ;;  %v2540_v41 = vmul.f32 3.8918573e-05, %v4929_v62 }
 0x6d0   : > { %v4936_v7 = vadd.f32 %v2476_v14, %v2368_v8  ;;  %v2529_v54 = vmul.f32 2.1237322e-06, %v4929_v62  ;;  %v3412_v8 = vld [vmem:[#allocation14 + $0x28] sm:$0xff] }
 0x6d1   : > { %v2490_v28 = vadd.f32 0.00028619796, %v2489_v29  ;;  %v2501_v11 = vadd.f32 0.001143296, %v2500_v55  ;;  %v2541_v58 = vadd.f32 0.001143296, %v2540_v41  ;;  %2791 = vmatpush.bf16.msrb.mxu0 %v3412_v8 }
 0x6d2   : > { %v4939_v12 = vmul.f32 0.70710677, %v4933_v21  ;;  %v4944_v25 = vmul.f32 0.70710677, %v4936_v7  ;;  %v2530_v49 = vadd.f32 0.00028619796, %v2529_v54 }
 0x6d3   : > { %v2502_v63 = vmul.f32 %v2501_v11, %v4927_v60  ;;  %v2542_v50 = vmul.f32 %v2541_v58, %v4929_v62  ;;  %v2491_v19 = vmul.f32 %v2490_v28, %v4927_v60  ;;  %v3411_v55 = vld [vmem:[#allocation14 + $0x20] sm:$0xff] }
 0x6d4   : > { %v2567_v38 = vmul.f32 %v4939_v12, %v4939_v12  ;;  %v2607_v32 = vmul.f32 %v4944_v25, %v4944_v25  ;;  %v2531_v0 = vmul.f32 %v2530_v49, %v4929_v62  ;;  %v3419_v58 = vld [vmem:[#allocation14 + $0x60] sm:$0xff] }
 0x6d5   : > { %v2503_v51 = vadd.f32 0.014752088, %v2502_v63  ;;  %v2543_v44 = vadd.f32 0.014752088, %v2542_v50  ;;  %v2492_v59 = vadd.f32 0.0036580483, %v2491_v19  ;;  %2792 = vmatpush.bf16.msrb.mxu0 %v3411_v55  ;;  %2806 = vmatpush.bf16.msra.mxu1 %v3419_v58 }
 0x6d6   : > { %v4952_v56 = vmin.f32 %v2567_v38, 16.0  ;;  %v4955_v13 = vmin.f32 %v2607_v32, 16.0  ;;  %v2532_v40 = vadd.f32 0.0036580483, %v2531_v0  ;;  %v3410_v19 = vld [vmem:[#allocation14 + $0x18] sm:$0xff] }
 0x6d7   : > { %v2504_v23 = vmul.f32 %v2503_v51, %v4927_v60  ;;  %v2544_v45 = vmul.f32 %v2543_v44, %v4929_v62  ;;  %v2493_v46 = vmul.f32 %v2492_v59, %v4927_v60  ;;  %v3418_v51 = vld [vmem:[#allocation14 + $0x58] sm:$0xff]  ;;  %v3409_v59 = vld [vmem:[#allocation14 + $0x10] sm:$0xff] }
 0x6d8   : > { %v2569_v53 = vmul.f32 2.1237322e-06, %v4952_v56  ;;  %v2580_v57 = vmul.f32 3.8918573e-05, %v4952_v56  ;;  %v2609_v1 = vmul.f32 2.1237322e-06, %v4955_v13  ;;  %v2533_v54 = vmul.f32 %v2532_v40, %v4929_v62 }
 0x6d9   : > { %v2505_v6 = vadd.f32 0.112945676, %v2504_v23  ;;  %v2545_v18 = vadd.f32 0.112945676, %v2544_v45  ;;  %v2620_v26 = vmul.f32 3.8918573e-05, %v4955_v13  ;;  %2793 = vmatpush.bf16.msrb.mxu0 %v3410_v19  ;;  %2807 = vmatpush.bf16.msra.mxu1 %v3418_v51 }
 0x6da   : > { %v2570_v33 = vadd.f32 0.00028619796, %v2569_v53  ;;  %v2581_v24 = vadd.f32 0.001143296, %v2580_v57  ;;  %v2610_v37 = vadd.f32 0.00028619796, %v2609_v1 }
 0x6db   : > { %v2506_v52 = vmul.f32 %v2505_v6, %v4927_v60  ;;  %v2546_v34 = vmul.f32 %v2545_v18, %v4929_v62  ;;  %v2621_v48 = vadd.f32 0.001143296, %v2620_v26  ;;  %v2494_v14 = vadd.f32 0.05243302, %v2493_v46  ;;  %v3417_v6 = vld [vmem:[#allocation14 + $0x50] sm:$0xff]  ;;  %v3408_v46 = vld [vmem:[#allocation14 + $0x8] sm:$0xff] }
 0x6dc   : > { %v2571_v20 = vmul.f32 %v2570_v33, %v4952_v56  ;;  %v2582_v17 = vmul.f32 %v2581_v24, %v4952_v56  ;;  %v2611_v50 = vmul.f32 %v2610_v37, %v4955_v13  ;;  %v2534_v10 = vadd.f32 0.05243302, %v2533_v54 }
 0x6dd   : > { %v2507_v39 = vadd.f32 0.4994258, %v2506_v52  ;;  %v2547_v9 = vadd.f32 0.4994258, %v2546_v34  ;;  %v2622_v11 = vmul.f32 %v2621_v48, %v4955_v13  ;;  %v2495_v38 = vmul.f32 %v2494_v14, %v4927_v60  ;;  %2794 = vmatpush.bf16.msrb.mxu0 %v3409_v59  ;;  %2808 = vmatpush.bf16.msra.mxu1 %v3417_v6  ;;  %v3407_v48 = vld [vmem:[#allocation14] sm:$0xff] }
 0x6de   : > { %v2583_v16 = vadd.f32 0.014752088, %v2582_v17  ;;  %v2572_v22 = vadd.f32 0.0036580483, %v2571_v20  ;;  %v2612_v49 = vadd.f32 0.0036580483, %v2611_v50  ;;  %v2535_v35 = vmul.f32 %v2534_v10, %v4929_v62 }
 0x6df   : > { %v2508_v61 = vmul.f32 %v2507_v39, %v4927_v60  ;;  %v2548_v43 = vmul.f32 %v2547_v9, %v4929_v62  ;;  %v2623_v44 = vadd.f32 0.014752088, %v2622_v11  ;;  %v2496_v57 = vadd.f32 0.18741608, %v2495_v38  ;;  %v3416_v39 = vld [vmem:[#allocation14 + $0x48] sm:$0xff]  ;;  %v3415_v14 = vld [vmem:[#allocation14 + $0x40] sm:$0xff] }
 0x6e0   : > { %v2584_v31 = vmul.f32 %v2583_v16, %v4952_v56  ;;  %v2573_v63 = vmul.f32 %v2572_v22, %v4952_v56  ;;  %v2613_v20 = vmul.f32 %v2612_v49, %v4955_v13  ;;  %v2536_v3 = vadd.f32 0.18741608, %v2535_v35 }
 0x6e1   : > { %v4971_v29 = vadd.f32 1.0, %v2508_v61  ;;  %v4973_v41 = vadd.f32 1.0, %v2548_v43  ;;  %v2624_v45 = vmul.f32 %v2623_v44, %v4955_v13  ;;  %v2497_v17 = vmul.f32 %v2496_v57, %v4927_v60  ;;  %2795 = vmatpush.bf16.msrb.mxu0 %v3408_v46  ;;  %2809 = vmatpush.bf16.msra.mxu1 %v3416_v39 }
 0x6e2   : > { %v2585_v28 = vadd.f32 0.112945676, %v2584_v31  ;;  %v2574_v4 = vadd.f32 0.05243302, %v2573_v63  ;;  %v2614_v43 = vadd.f32 0.05243302, %v2613_v20  ;;  %v2537_v38 = vmul.f32 %v2536_v3, %v4929_v62 }
 0x6e3   : > { %3624 = vrcp.f32 %v4971_v29  ;;  %v2625_v1 = vadd.f32 0.112945676, %v2624_v45  ;;  %v2521_v8 = vand.u32 2147483648, %v4971_v29  ;;  %v2498_v31 = vadd.f32 1.1283791, %v2497_v17 }
 0x6e4   : > { %3626 = vrcp.f32 %v4973_v41  ;;  %v2586_v32 = vmul.f32 %v2585_v28, %v4952_v56  ;;  %v2575_v0 = vmul.f32 %v2574_v4, %v4952_v56  ;;  %vm2515_vm13 = vweird.f32 %v4971_v29 }
 0x6e5   : > { %v2626_v26 = vmul.f32 %v2625_v1, %v4955_v13  ;;  %v2519_v60 = vand.u32 2147483647, %v4971_v29  ;;  %v2522_v54 = vor.u32 1.1754944e-38, %v2521_v8  ;;  %v2615_v50 = vmul.f32 %v2614_v43, %v4955_v13  ;;  %2796 = vmatpush.bf16.msrb.mxu0 %v3407_v48  ;;  %2810 = vmatpush.bf16.msra.mxu1 %v3415_v14 }
 0x6e6   : > { %v2587_v23 = vadd.f32 0.4994258, %v2586_v32  ;;  %v2576_v61 = vadd.f32 0.18741608, %v2575_v0  ;;  %v2561_v44 = vand.u32 2147483648, %v4973_v41  ;;  %vm2555_vm1 = vweird.f32 %v4973_v41 }
 0x6e7   : > { %v2627_v40 = vadd.f32 0.4994258, %v2626_v26  ;;  %vm2520_vm15 = vcmp.eq.f32.partialorder %v2519_v60, 8.507059e+37  ;;  %v2538_v57 = vadd.f32 1.1283791, %v2537_v38 }
 0x6e8   : > { %v2588_v24 = vmul.f32 %v2587_v23, %v4952_v56  ;;  %v2577_v11 = vmul.f32 %v2576_v61, %v4952_v56  ;;  %v2559_v56 = vand.u32 2147483647, %v4973_v41  ;;  %v2616_v23 = vadd.f32 0.18741608, %v2615_v50  ;;  %v3583_v38 = vld [vmem:[%s5159_s30] ss:$0 sm:$0xff] }
 0x6e9   : > { %v3625_v53 = vpop.eup %3624  ;;  %v2628_v37 = vmul.f32 %v2627_v40, %v4955_v13  ;;  %v2562_v6 = vor.u32 1.1754944e-38, %v2561_v44 }
 0x6ea   : > { %v4984_v18 = vpop.eup %3626  ;;  %v2511_v33 = vmul.f32 %v3625_v53, %v4971_v29  ;;  %v4992_v34 = vadd.f32 1.0, %v2588_v24  ;;  %vm2516_vm12 = vweird.f32 %v3625_v53  ;;  %v2499_v29 = vmul.f32 %v2498_v31, %v4918_v36 }
 0x6eb   : > { %v2551_v52 = vmul.f32 %v4984_v18, %v4973_v41  ;;  %vm2517_vm14 = vmor %vm2515_vm13, %vm2516_vm12  ;;  %v5005_v58 = vadd.f32 1.0, %v2628_v37  ;;  %vm2556_vm0 = vweird.f32 %v4984_v18  ;;  %v2578_v4 = vadd.f32 1.1283791, %v2577_v11 }
 0x6ec   : > { %v2512_v5 = vsub.f32 1.0, %v2511_v33  ;;  %3628 = vrcp.f32 %v4992_v34  ;;  %v2599_v62 = vand.u32 2147483647, %v4992_v34  ;;  %v2601_v10 = vand.u32 2147483648, %v4992_v34  ;;  %vm5019_vm2 = vmor %vm2555_vm1, %vm2556_vm0 }
 0x6ed   : > { %v2552_v16 = vsub.f32 1.0, %v2551_v52  ;;  %3630 = vrcp.f32 %v5005_v58  ;;  %vm2560_vm4 = vcmp.eq.f32.partialorder %v2559_v56, 8.507059e+37  ;;  %vm2595_vm5 = vweird.f32 %v4992_v34 }
 0x6ee   : > { %v2513_v9 = vmul.f32 %v3625_v53, %v2512_v5  ;;  %v2579_v24 = vmul.f32 %v2578_v4, %v4939_v12  ;;  %vm2600_vm7 = vcmp.eq.f32.partialorder %v2599_v62, 8.507059e+37  ;;  %v2602_v52 = vor.u32 1.1754944e-38, %v2601_v10 }
 0x6ef   : > { %v2553_v55 = vmul.f32 %v4984_v18, %v2552_v16  ;;  %v2617_v0 = vmul.f32 %v2616_v23, %v4955_v13  ;;  %v2641_v12 = vand.u32 2147483648, %v5005_v58  ;;  %v2479_v13 = vmul.f32 0.5, %v4913_v2 }
 0x6f0   : > { %v2514_v22 = vadd.f32 %v3625_v53, %v2513_v9  ;;  %v2639_v9 = vand.u32 2147483647, %v5005_v58  ;;  %vm2635_vm9 = vweird.f32 %v5005_v58 }
 0x6f1   : > { %v2554_v32 = vadd.f32 %v4984_v18, %v2553_v55  ;;  %v2642_v31 = vor.u32 1.1754944e-38, %v2641_v12 }
 0x6f2   : > { %v2518_v28 = vsel %vm2517_vm14, %v3625_v53, %v2514_v22  ;;  %v3629_v63 = vpop.eup %3628  ;;  %v2481_v22 = vmul.f32 0.5, %v4933_v21  ;;  %vm2640_vm11 = vcmp.eq.f32.partialorder %v2639_v9, 8.507059e+37  ;;  %v2480_v21 = vmul.f32 0.5, %v4915_v47 }
 0x6f3   : > { %v2591_v19 = vmul.f32 %v3629_v63, %v4992_v34  ;;  %v2523_v51 = vsel %vm2520_vm15, %v2522_v54, %v2518_v28  ;;  %vm2596_vm3 = vweird.f32 %v3629_v63  ;;  %v2558_v59 = vsel %vm5019_vm2, %v4984_v18, %v2554_v32  ;;  %v3631_v33 = vpop.eup %3630 }
 0x6f4   : > { %v2524_v49 = vmul.f32 %v2523_v51, %v2499_v29  ;;  %vm2597_vm6 = vmor %vm2595_vm5, %vm2596_vm3  ;;  %v2563_v5 = vsel %vm2560_vm4, %v2562_v6, %v2558_v59  ;;  %v2631_v20 = vmul.f32 %v3631_v33, %v5005_v58  ;;  %v2539_v18 = vmul.f32 %v2538_v57, %v4921_v30 }
 0x6f5   : > { %v2592_v36 = vsub.f32 1.0, %v2591_v19  ;;  %v2618_v34 = vadd.f32 1.1283791, %v2617_v0  ;;  %vm2636_vm8 = vweird.f32 %v3631_v33 }
 0x6f6   : > { %v3284_v1 = vclamps-f32 %v2524_v49, 1.0  ;;  %v2632_v46 = vsub.f32 1.0, %v2631_v20  ;;  %v2564_v39 = vmul.f32 %v2563_v5, %v2539_v18  ;;  %vm2637_vm10 = vmor %vm2635_vm9, %vm2636_vm8 }
 0x6f7   : > { %v2593_v53 = vmul.f32 %v3629_v63, %v2592_v36  ;;  %v2619_v43 = vmul.f32 %v2618_v34, %v4944_v25 }
 0x6f8   : > { %v2647_v16 = vadd.f32 1.0, %v3284_v1  ;;  %v2633_v40 = vmul.f32 %v3631_v33, %v2632_v46  ;;  %v3285_v30 = vclamps-f32 %v2564_v39, 1.0  ;;  %v3585_v39 = vld [vmem:[%s5162_s2] ss:$0 sm:$0xff] }
 0x6f9   : > { %v2594_v41 = vadd.f32 %v3629_v63, %v2593_v53 }
 0x6fa   : > { %v2634_v3 = vadd.f32 %v3631_v33, %v2633_v40  ;;  %v2651_v60 = vmul.f32 %v2647_v16, %v2479_v13  ;;  %v2648_v11 = vadd.f32 1.0, %v3285_v30 }
 0x6fb   : > { %v2598_v35 = vsel %vm2597_vm6, %v3629_v63, %v2594_v41  ;;  %v2482_v63 = vmul.f32 0.5, %v4936_v7 }
 0x6fc   : > { %v2603_v17 = vsel %vm2600_vm7, %v2602_v52, %v2598_v35  ;;  %v2638_v48 = vsel %vm2637_vm10, %v3631_v33, %v2634_v3  ;;  %v2652_v54 = vmul.f32 %v2648_v11, %v2480_v21 }
 0x6fd   : > { %v2604_v26 = vmul.f32 %v2603_v17, %v2579_v24  ;;  %v2643_v14 = vsel %vm2640_vm11, %v2642_v31, %v2638_v48 }
 0x6fe   : > { %v2644_v28 = vmul.f32 %v2643_v14, %v2619_v43 }
 0x6ff   : > { %v3286_v61 = vclamps-f32 %v2604_v26, 1.0  ;;  %v3584_v26 = vld [vmem:[%s5161_s27] ss:$0 sm:$0xff] }
 0x700   : > { %v3287_v2 = vclamps-f32 %v2644_v28, 1.0 }
 0x701   : > { %v2649_v8 = vadd.f32 1.0, %v3286_v61 }
 0x702   : > { %v2650_v58 = vadd.f32 1.0, %v3287_v2 }
 0x703   : > { %v2653_v37 = vmul.f32 %v2649_v8, %v2481_v22 }
 0x704   : > { %v2654_v50 = vmul.f32 %v2650_v58, %v2482_v63 }
 0x705   : > { %v2655_v55 = vpack.c.bf16 %v2653_v37, %v2651_v60 }
 0x706   : > { %v2656_v25 = vpack.c.bf16 %v2654_v50, %v2652_v54 }
 0x707   : > { %2797 = vmatmul.bf16.vlgmr.msrb.gmra.mxu0 %v2655_v55 }
 0x708   : > { %2811 = vmatmul.bf16.vlgmr.msra.gmra.mxu1 %v2656_v25 }
 0x784   : > { %v2798_v29 = vpop.f32.mrf.mxu0 }
 0x785   : > { %v2799_v19 = vadd.f32 %v3583_v38, %v2798_v29  ;;  %v2812_v51 = vpop.f32.mrf.mxu1 }
 0x787   : > { %v2813_v32 = vadd.f32 %v2812_v51, %v2799_v19 }
 0x789   : > { %v2817_v44 = vadd.f32 %v2813_v32, %v4904_v27 }
 0x78b   : > { %2821 = vadd.xlane.f32.xlu1 %v2817_v44 }
 0x78c   : > { %v2800_v56 = vpop.f32.mrf.mxu0 }
 0x78d   : > { %v2801_v47 = vadd.f32 %v3583_v38, %v2800_v56  ;;  %v2814_v4 = vpop.f32.mrf.mxu1 }
 0x78f   : > { %v2815_v7 = vadd.f32 %v2814_v4, %v2801_v47 }
 0x791   : > { %v2818_v36 = vadd.f32 %v2815_v7, %v4906_v15 }
 0x793   : > { %2823 = vadd.xlane.f32.xlu0 %v2818_v36 }
 0x7fe   : > { %v2822_v62 = vpop.xlane.xlu1 %2821 }
 0x7ff   : > { %v2825_v10 = vmul.f32 %v2822_v62, %v4882_v42 }
 0x801   : > { %v2827_v23 = vsub.f32 %v2817_v44, %v2825_v10 }
 0x803   : > { %v2829_v49 = vmul.f32 %v2827_v23, %v2827_v23 }
 0x805   : > { %2831 = vadd.xlane.f32.xlu2 %v2829_v49 }
 0x806   : > { %v2824_v45 = vpop.xlane.xlu0 %2823 }
 0x807   : > { %v2826_v53 = vmul.f32 %v2824_v45, %v4882_v42 }
 0x809   : > { %v2828_v57 = vsub.f32 %v2818_v36, %v2826_v53 }
 0x80b   : > { %v2830_v59 = vmul.f32 %v2828_v57, %v2828_v57 }
 0x80d   : > { %2833 = vadd.xlane.f32.xlu1 %v2830_v59 }
 0x878   : > { %v2832_v27 = vpop.xlane.xlu2 %2831 }
 0x879   : > { %v2835_v6 = vmul.f32 %v2832_v27, %v4882_v42 }
 0x87b   : > { %v2837_v41 = vadd.f32 1e-12, %v2835_v6 }
 0x87d   : > { %3632 = vrsqrt.f32 %v2837_v41  ;;  %vm2845_vm13 = vweird.f32 %v2837_v41 }
 0x880   : > { %v2834_v33 = vpop.xlane.xlu1 %2833 }
 0x881   : > { %v2836_v15 = vmul.f32 %v2834_v33, %v4882_v42 }
 0x883   : > { %v3633_v24 = vpop.eup %3632  ;;  %v2838_v52 = vadd.f32 1e-12, %v2836_v15 }
 0x884   : > { %v2840_v0 = vmul.f32 %v3633_v24, %v2837_v41  ;;  %vm2846_vm12 = vweird.f32 %v3633_v24 }
 0x885   : > { %3634 = vrsqrt.f32 %v2838_v52  ;;  %vm2847_vm14 = vmor %vm2845_vm13, %vm2846_vm12  ;;  %vm2855_vm0 = vweird.f32 %v2838_v52 }
 0x886   : > { %v2841_v1 = vmul.f32 %v3633_v24, %v2840_v0 }
 0x888   : > { %v2842_v5 = vmul.f32 0.5, %v2841_v1 }
 0x88a   : > { %v2843_v35 = vsub.f32 1.5, %v2842_v5 }
 0x88b   : > { %v3635_v20 = vpop.eup %3634 }
 0x88c   : > { %v2844_v18 = vmul.f32 %v3633_v24, %v2843_v35  ;;  %v2850_v17 = vmul.f32 %v3635_v20, %v2838_v52  ;;  %vm2856_vm15 = vweird.f32 %v3635_v20 }
 0x88d   : > { %vm2857_vm1 = vmor %vm2855_vm0, %vm2856_vm15 }
 0x88e   : > { %v2848_v42 = vsel %vm2847_vm14, %v3633_v24, %v2844_v18  ;;  %v2851_v46 = vmul.f32 %v3635_v20, %v2850_v17 }
 0x88f   : > { %v2859_v34 = vmul.f32 %v2848_v42, %v2827_v23 }
 0x890   : > { %v2852_v9 = vmul.f32 0.5, %v2851_v46 }
 0x891   : > { %v2864_v12 = vmul.f32 %v3584_v26, %v2859_v34 }
 0x892   : > { %v2853_v16 = vsub.f32 1.5, %v2852_v9 }
 0x893   : > { %v2869_v61 = vadd.f32 %v3585_v39, %v2864_v12 }
 0x894   : > { %v2854_v40 = vmul.f32 %v3635_v20, %v2853_v16 }
 0x895   : > { %2871 = vst [vmem:[%s698_s3] sm:$0xff] %v2869_v61 }
 0x896   : > { %v2858_v13 = vsel %vm2857_vm1, %v3635_v20, %v2854_v40 }
 0x897   : > { %v2860_v22 = vmul.f32 %v2858_v13, %v2828_v57 }
 0x899   : > { %v2865_v8 = vmul.f32 %v3584_v26, %v2860_v22 }
 0x89b   : > { %v2870_v3 = vadd.f32 %v3585_v39, %v2865_v8 }
 0x89d   : > { %2872 = vst [vmem:[%s698_s3 + $0x8] sm:$0xff] %v2870_v3 }
 0x89e   : > { %3905 = shalt.err (!%p3902_p13)
}
 0x89f   : > { %s3998_s12 = smov 128   ;;  %s3999_s25 = smov 8  }
 0x8a0   : > { %3452 = dma.vmem_to_hbm [thread:$0]  (%p4202_p2), %s2889_s14, 256, %s2891_s19, %s2874_s24, %s3998_s12, %s3998_s12, %s3999_s25  }
 0x8a1 PF: > { %s2905_s27 = sand.u32 1, %s3960_s21   ;;  %p3481_p0 = pnand %p3067_p6, %p4209_p5 }
 0x8a2   : > { %s2906_s11 = scalar_lea.sflag [#allocation4], %s2905_s27 }
 0x8a3   : > { %p3482_p4 = pneg %p3481_p0 }
 0x8a5   : > { %3955 = dma.done.wait (%p3482_p4), %s2906_s11, 256  }
 0x8a6   : > { %3957 = vsyncadd (%p3482_p4), %s2906_s11, 4294967040  ;;  %s38_s26 = sadd.s32 1, %s3980_s26   ;;  %s5165_s29 = sld [smem:[#allocation24_spill]] }
 0x8a7   : > { %p35_p7 = scmp.ge.s32.totalorder %s38_s26, 4   ;;  %s5166_s23 = sld [smem:[#allocation28_spill]] }
 0x8a8   : > { %s5167_s24 = sld [smem:[#allocation26_spill]]  ;;  %s5169_s21 = smov %s3964_s22 }
 0x8a9   : > { %s5168_s25 = sld [smem:[#allocation27_spill]]  ;;  %37 = sbr.rel (!%p35_p7) target bundleno = 25 (0x19), region = 166 }
 0x8ac   : > { %s5170_s22 = smov %s5165_s29 }
 0x8ae   :  { %2912 = vsyncpa [#allocation3], 1 }
 0x8af   :  { %2914 = vsyncpa [#allocation3 + $0x1], 1 }
 0x8b0   :  { %2915 = vsyncpa [#allocation6], 1 }
 0x8b1   :  { %2917 = vsyncpa [#allocation6 + $0x1], 1 }
 0x8b2   :  { %2918 = vsyncpa [#allocation9], 1 }
 0x8b3   :  { %2919 = vsyncpa [#allocation12], 1 }
 0x8b4   :  { %2920 = vsyncpa [#allocation15], 1 }
 0x8b5   :  { %2921 = vsyncpa [#allocation4], 1 }
 0x8b6   :  { %2923 = vsyncpa [#allocation4 + $0x1], 1 }

</bundles_post_ra>
